<compile_context>
chip_gen: v5e
topology: v5e:2x2
jax: 0.10.0
libtpu: 0.0.40
codegen_flags: <defaults>
</compile_context>

<pallas_src>
import functools

import numpy as np
import jax
import jax.numpy as jnp
from jax.experimental import pallas as pl
from jax.experimental.pallas import tpu as pltpu


# ------------------------------ small helpers -------------------------------- #

def _round_up(x, m):
    return ((x + m - 1) // m) * m


def _pick_tile(n, candidates, min_tiles=1):
    """Largest candidate dividing n; prefer one that leaves >= min_tiles tiles."""
    divisors = [t for t in candidates if n % t == 0]
    if not divisors:
        return n
    for t in divisors:                      # candidates are descending
        if n // t >= min_tiles:
            return t
    return divisors[-1]


def _vmem_capacity_bytes():
    try:
        return int(pltpu.get_tpu_info().vmem_capacity_bytes)
    except Exception:
        return 64 * 1024 * 1024             # v7x floor -> safe everywhere


def _vmem_limit_bytes(cap):
    return max(32 * 1024 * 1024, min(3 * cap // 4, 112 * 1024 * 1024))


def xavier_uniform(key, shape, gain):
    fan_in, fan_out = shape[-2], shape[-1]
    bound = gain * jnp.sqrt(6.0 / (fan_in + fan_out))
    return jax.random.uniform(key, shape, jnp.float32, -bound, bound)


# ------------------------------ Pallas kernel --------------------------------- #

def _hetero_relconv_kernel(
        # scalar prefetch (SMEM)
        src_tid_ref, dst_tid_ref, blk_mask_ref, rel_any_ref,
        ablk_r_ref, ablk_i_ref, ablk_k_ref,
        # VMEM inputs
        a_ref, x_ref, basis_ref, bias_ref, comb_ref,
        # VMEM output (written once per (dst type, row tile))
        o_ref,
        # VMEM scratch
        msg_ref, acc_ref,
        *, num_bases, tk, x_resident):
    """One grid step = (dst-row tile i, relation r, src tile k).

    a_ref:     (TM, TK)            bf16  exact {0,1} adjacency tile of rel r
    x_ref:     (N_pad, Fi) or (TK, Fi) bf16  src-type features (resident/tiled)
    basis_ref: (NB, Fi, Fo)        bf16  weight-basis stack (resident)
    bias_ref:  (1, Fo)             f32   shared bias (resident)
    comb_ref:  (TM, NB)            f32   w_comp[r, b] * 1/in_degree (per row)
    o_ref:     (TM, Fo)            f32   output row-tile of dst type dst_tid[r]
    msg_ref:   (TM, Fi)            f32   neighbour-contraction accumulator
    acc_ref:   (NB, TM, Fi)        f32   per-basis dst-group accumulators
    """
    i = pl.program_id(0)
    r = pl.program_id(1)
    k = pl.program_id(2)
    num_r = pl.num_programs(1)
    num_k = pl.num_programs(2)

    dst_t = dst_tid_ref[r]
    # Relations are grouped by dst type -> the output block's visits are
    # consecutive; detect first/last visit from the neighbouring dst ids.
    first_rel_for_dst = jnp.logical_or(
        r == 0, dst_tid_ref[jnp.maximum(r - 1, 0)] != dst_t)
    last_rel_for_dst = jnp.logical_or(
        r == num_r - 1, dst_tid_ref[jnp.minimum(r + 1, num_r - 1)] != dst_t)

    step = (i * num_r + r) * num_k + k
    nnz = blk_mask_ref[step]
    rel_has_work = rel_any_ref[i * num_r + r] > 0

    # (1) first relation of a dst group -> zero the basis accumulators.
    @pl.when(jnp.logical_and(k == 0, first_rel_for_dst))
    def _():
        acc_ref[...] = jnp.zeros_like(acc_ref)

    # (2) start of this relation's neighbour contraction -> reset message acc
    #     (skipped entirely when the relation never touches this row tile).
    @pl.when(jnp.logical_and(k == 0, rel_has_work))
    def _():
        msg_ref[...] = jnp.zeros_like(msg_ref)

    # (3) block-sparse compute: all-zero A tiles are skipped on the MXU (their
    #     HBM DMA is already elided by the redirected A index_map).
    @pl.when(nnz > 0)
    def _():
        if x_resident:
            start = pl.multiple_of(k * tk, tk)
            x_blk = x_ref[pl.ds(start, tk), :]
        else:
            x_blk = x_ref[...]
        msg_ref[...] += jnp.dot(a_ref[...], x_blk,
                                preferred_element_type=jnp.float32)

    # (4) end of this relation's contraction: fold the f32 right-normalization
    #     and the weight-basis coefficients into the per-basis accumulators.
    @pl.when(jnp.logical_and(k == num_k - 1, rel_has_work))
    def _():
        m = msg_ref[...]
        for b in range(num_bases):
            acc_ref[b] += m * comb_ref[:, b:b + 1]

    # (5) last relation targeting this dst type: apply each basis matrix once
    #     per (dst type, row tile), add the shared bias, write the output.
    @pl.when(jnp.logical_and(k == num_k - 1, last_rel_for_dst))
    def _():
        res = jnp.dot(acc_ref[0].astype(basis_ref.dtype), basis_ref[0],
                      preferred_element_type=jnp.float32)
        for b in range(1, num_bases):
            res += jnp.dot(acc_ref[b].astype(basis_ref.dtype), basis_ref[b],
                           preferred_element_type=jnp.float32)
        o_ref[...] = res + bias_ref[...]


def hetero_rel_graph_conv(a_stack, x_types, basis, bias, comb,
                          rel_src, rel_dst, blk_mask, rel_any,
                          ablk_r, ablk_i, ablk_k,
                          *, num_dst_types, tm, tk):
    """out[dst(r)] += (D_r^{-1} A_r @ X_src(r)) @ (sum_b c_rb B_b) + bias.

    a_stack: [R, N_pad, N_pad] bf16  exact {0,1}, padded, dst/src-grouped
    x_types: [T, N_pad, F_in_pad] bf16  one block per node TYPE
    basis:   [NB, F_in_pad, F_out_pad] bf16
    bias:    [1, F_out_pad] f32
    comb:    [R, N_pad, NB] f32   w_comp[r, b] / in_degree_r(row)
    rel_src/rel_dst: int32[R]   scalar-prefetched type ids
    blk_mask/rel_any/ablk_*: int32  block occupancy + DMA-redirect tables
    returns: [num_dst_types, N_pad, F_out_pad] f32
    """
    num_rels, n_pad, _ = a_stack.shape
    num_bases = basis.shape[0]
    f_in_p = x_types.shape[-1]
    f_out_p = basis.shape[-1]
    ni = n_pad // tm
    nk = n_pad // tk

    vmem_cap = _vmem_capacity_bytes()
    # Resident X (double-buffered bf16) must leave headroom in scoped VMEM.
    x_resident = (2 * n_pad * f_in_p * 2) <= vmem_cap // 4

    kernel = functools.partial(_hetero_relconv_kernel,
                               num_bases=num_bases, tk=tk,
                               x_resident=x_resident)

    # A index_map: redirect zero blocks to the previously fetched block so the
    # unchanged block index elides the DMA (block-sparse DMA skip).
    def a_index(i, r, k, *s):
        step = (i * num_rels + r) * nk + k
        return (s[4][step], s[5][step], s[6][step])

    if x_resident:
        x_spec = pl.BlockSpec((None, n_pad, f_in_p),
                              lambda i, r, k, *s: (s[0][r], 0, 0))
    else:
        # TODO(synk): also column-tile F_in when a single (tk, F_in) slab is
        # too large for the v7x 64 MiB scoped budget.
        x_spec = pl.BlockSpec((None, tk, f_in_p),
                              lambda i, r, k, *s: (s[0][r], k, 0))

    out = pl.pallas_call(
        kernel,
        # Output rows flattened as (dst_type, row_tile): every block is
        # lane-dense (F_out_pad multiple of 128) and 2-D in the kernel.
        out_shape=jax.ShapeDtypeStruct((num_dst_types * n_pad, f_out_p),
                                       jnp.float32),
        grid_spec=pltpu.PrefetchScalarGridSpec(
            num_scalar_prefetch=7,
            grid=(ni, num_rels, nk),
            in_specs=[
                # adjacency tile (DMA elided on zero blocks via redirect)
                pl.BlockSpec((None, tm, tk), a_index),
                # source-type features: VMEM-resident, re-DMA'd only on a
                # src-type switch (relations sorted by (dst, src))
                x_spec,
                # full basis stack: constant index -> fetched once, resident
                pl.BlockSpec((num_bases, f_in_p, f_out_p),
                             lambda i, r, k, *s: (0, 0, 0)),
                # shared bias: constant index -> resident
                pl.BlockSpec((1, f_out_p), lambda i, r, k, *s: (0, 0)),
                # per-(relation, dst row) f32 scale = w_comp[r,b] / in_degree
                pl.BlockSpec((None, tm, num_bases),
                             lambda i, r, k, *s: (r, i, 0)),
            ],
            out_specs=pl.BlockSpec(
                (tm, f_out_p),
                lambda i, r, k, *s: (s[1][r] * ni + i, 0)),
            scratch_shapes=[
                pltpu.VMEM((tm, f_in_p), jnp.float32),             # msg
                pltpu.VMEM((num_bases, tm, f_in_p), jnp.float32),  # basis acc
            ],
        ),
        compiler_params=pltpu.CompilerParams(
            # row-tile axis shards across TensorCores (v7x megacore); relation
            # and contraction axes are reductions into resident accumulators.
            dimension_semantics=("parallel", "arbitrary", "arbitrary"),
            vmem_limit_bytes=_vmem_limit_bytes(vmem_cap),
        ),
    )(rel_src, rel_dst, blk_mask, rel_any, ablk_r, ablk_i, ablk_k,
      a_stack, x_types, basis, bias, comb)

    return out.reshape(num_dst_types, n_pad, f_out_p)


# --------------------------- graph preprocessing ------------------------------ #

def build_graph_batch(adjs, canonical, rel_names, num_nodes):
    """Pad + group the raw {0,1} relation adjacencies once, reused per layer."""
    ntypes = sorted(num_nodes)                               # feature stack order
    src_tid = {t: i for i, t in enumerate(ntypes)}
    dst_ntypes = sorted({canonical[e][1] for e in rel_names})
    dst_tid = {t: i for i, t in enumerate(dst_ntypes)}

    # Group relations by (dst type, src type): dst grouping makes output-block
    # revisits consecutive; src sub-grouping maximises resident-X reuse.
    rel_sorted = sorted(rel_names)
    rel_order = sorted(rel_sorted,
                       key=lambda e: (dst_tid[canonical[e][1]],
                                      src_tid[canonical[e][0]], e))
    rel_perm = jnp.array([rel_sorted.index(e) for e in rel_order], jnp.int32)
    num_rels = len(rel_order)

    n_pad = _round_up(max(num_nodes.values()), 128)
    # Prefer >=2 row tiles so the parallel axis feeds both v7x TensorCores.
    tm = _pick_tile(n_pad, (1024, 512, 256, 128), min_tiles=2)
    tk = _pick_tile(n_pad, (1024, 512, 256, 128))
    ni, nk = n_pad // tm, n_pad // tk
    # TODO(synk): for tiny graphs (ni == 1) fold the dst-type axis into the
    # parallel grid axis so both v7x TensorCores still get work.

    a_raw = jnp.stack([
        jnp.pad(adjs[e].astype(jnp.float32),
                ((0, n_pad - adjs[e].shape[0]), (0, n_pad - adjs[e].shape[1])))
        for e in rel_order])                                  # [R, n_pad, n_pad]

    # norm='right': divide aggregated messages by dst in-degree (clamp to 1).
    deg = a_raw.sum(axis=2)                                   # [R, n_pad]
    inv_deg = 1.0 / jnp.maximum(deg, 1.0)                     # f32, exact scale

    # Block occupancy + DMA-redirect tables (flattened [ni, R, nk] order).
    a_np = np.asarray(a_raw)
    nz = (a_np != 0).reshape(num_rels, ni, tm, nk, tk).any(axis=(2, 4))
    nz = nz.transpose(1, 0, 2)                                # [ni, R, nk]
    blk_mask = jnp.asarray(nz.astype(np.int32).reshape(-1))
    rel_any = jnp.asarray(nz.any(axis=2).astype(np.int32).reshape(-1))

    ablk_r = np.zeros((ni, num_rels, nk), np.int32)
    ablk_i = np.zeros((ni, num_rels, nk), np.int32)
    ablk_k = np.zeros((ni, num_rels, nk), np.int32)
    prev = None
    # TODO(synk): vectorize / compact this nonzero-block walk for huge graphs
    # (SMEM tables scale as ni*R*nk; compact to a dense nonzero-block grid).
    for i in range(ni):
        for r in range(num_rels):
            for k in range(nk):
                if nz[i, r, k] or prev is None:
                    prev = (r, i, k)
                ablk_r[i, r, k], ablk_i[i, r, k], ablk_k[i, r, k] = prev

    # TODO(synk): int8 {0,1} adjacency on v5e/v6e (int8 MXU) / fp8 on v7x for
    # a further 2x cut of the dominant adjacency HBM stream.
    return dict(
        ntypes=ntypes,
        dst_ntypes=dst_ntypes,
        rel_order=rel_order,
        rel_perm=rel_perm,
        a=a_raw.astype(jnp.bfloat16),            # exact {0,1} values in bf16
        inv_deg=inv_deg,
        blk_mask=blk_mask,
        rel_any=rel_any,
        ablk_r=jnp.asarray(ablk_r.reshape(-1)),
        ablk_i=jnp.asarray(ablk_i.reshape(-1)),
        ablk_k=jnp.asarray(ablk_k.reshape(-1)),
        rel_src=jnp.array([src_tid[canonical[e][0]] for e in rel_order], jnp.int32),
        rel_dst=jnp.array([dst_tid[canonical[e][1]] for e in rel_order], jnp.int32),
        n_pad=n_pad, tm=tm, tk=tk,
        num_nodes=dict(num_nodes),
    )


# --------------------------- Model (glue in JAX) ------------------------------ #

class RelGraphConvLayerPallas:
    """Mirrors RelGraphConvLayer(in, out, rel_names, num_bases, norm='right',
    weight=True, bias=True, activation=None, dropout=None, self_loop=False)."""

    def __init__(self, key, in_feats, out_feats, rel_names, canonical, num_bases):
        self.in_feats = in_feats
        self.out_feats = out_feats
        self.rel_names = sorted(rel_names)
        self.canonical = canonical
        num_rels = len(self.rel_names)
        self.use_basis = num_bases < num_rels
        gain = jnp.sqrt(2.0)                     # calculate_gain('relu')
        k1, k2 = jax.random.split(key)
        if self.use_basis:
            # WeightBasis: W_r = sum_b w_comp[r, b] * basis[b] -- the basis
            # decomposition is applied inside the kernel (never materialized).
            self.basis = xavier_uniform(k1, (num_bases, in_feats, out_feats), gain)
            self.w_comp = xavier_uniform(k2, (num_rels, num_bases), gain)
        else:
            # Direct per-relation weights == identity coefficients.
            # TODO(synk): for very large R use a dedicated non-basis kernel to
            # avoid the (R, tm, F_in) accumulator scratch.
            self.basis = xavier_uniform(k1, (num_rels, in_feats, out_feats), gain)
            self.w_comp = jnp.eye(num_rels, dtype=jnp.float32)
        self.bias = jnp.zeros((out_feats,), jnp.float32)     # init.zeros_

    def __call__(self, gb, inputs):
        f_in_p = _round_up(self.in_feats, 128)
        f_out_p = _round_up(self.out_feats, 128)
        n_pad = gb['n_pad']

        # Per-node-TYPE feature stack (no per-relation duplication), lane-padded,
        # bf16 for HBM/MXU; accumulation stays f32 inside the kernel.
        x_types = jnp.stack([
            jnp.pad(inputs[t].astype(jnp.float32),
                    ((0, n_pad - inputs[t].shape[0]),
                     (0, f_in_p - self.in_feats)))
            for t in gb['ntypes']]).astype(jnp.bfloat16)

        basis_p = jnp.pad(self.basis,
                          ((0, 0),
                           (0, f_in_p - self.in_feats),
                           (0, f_out_p - self.out_feats))).astype(jnp.bfloat16)
        bias_p = jnp.pad(self.bias, (0, f_out_p - self.out_feats)).reshape(1, f_out_p)

        # Fuse the f32 right-normalization with the basis coefficients:
        # comb[r, row, b] = w_comp[r, b] / in_degree_r(row)
        wc = self.w_comp[gb['rel_perm']]                         # [R, NB]
        comb = gb['inv_deg'][:, :, None] * wc[:, None, :]        # [R, n_pad, NB]

        out_pad = hetero_rel_graph_conv(
            gb['a'], x_types, basis_p, bias_p, comb,
            gb['rel_src'], gb['rel_dst'], gb['blk_mask'], gb['rel_any'],
            gb['ablk_r'], gb['ablk_i'], gb['ablk_k'],
            num_dst_types=len(gb['dst_ntypes']), tm=gb['tm'], tk=gb['tk'])

        return {t: out_pad[i, :gb['num_nodes'][t], :self.out_feats]
                for i, t in enumerate(gb['dst_ntypes'])}


class EntityClassifyPallas:
    """EntityClassify with defaults: layer_norm=False, dropouts=0,
    activation=None, self_loop=False -> those are identities."""

    def __init__(self, key, rel_names, canonical_etypes, in_feats,
                 hidden_feats, out_feats, num_bases, num_layers):
        if isinstance(hidden_feats, int):
            hidden_feats = [hidden_feats] * (num_layers - 1)
        self.rel_names = sorted(rel_names)
        self.canonical = dict(canonical_etypes)
        num_rels = len(self.rel_names)
        if num_bases < 0 or num_bases > num_rels:
            num_bases = num_rels
        dims = [in_feats] + list(hidden_feats) + [out_feats]
        keys = jax.random.split(key, num_layers)
        self.layers = [
            RelGraphConvLayerPallas(keys[i], dims[i], dims[i + 1],
                                    self.rel_names, self.canonical, num_bases)
            for i in range(num_layers)
        ]

    def __call__(self, adjs, inputs):
        # Prepare the padded / grouped graph once; reused by every layer.
        gb = build_graph_batch(adjs, self.canonical, self.rel_names,
                               {t: v.shape[0] for t, v in inputs.items()})
        x = dict(inputs)                  # input_dropout(p=0) == identity
        for layer in self.layers:
            x = layer(gb, x)
            # between layers: layer_norm=None, activation=None, dropout(0) -> id
        return x


# -------------------------------- reference ----------------------------------- #

def reference_forward(model, adjs, inputs):
    """Pure f32 JAX reference of the module semantics (no padding, no bf16)."""
    x = dict(inputs)
    for layer in model.layers:
        weight = jnp.einsum('rb,bio->rio', layer.w_comp, layer.basis)
        new_x = {}
        for ridx, e in enumerate(layer.rel_names):
            src, dst = layer.canonical[e]
            a = adjs[e]
            deg = jnp.maximum(a.sum(axis=1, keepdims=True), 1.0)  # norm='right'
            contrib = ((a / deg) @ x[src]) @ weight[ridx]
            new_x[dst] = contrib if dst not in new_x else new_x[dst] + contrib
        x = {t: h + layer.bias for t, h in new_x.items()}
    return x


# ----------------------------------- main -------------------------------------- #

if __name__ == "__main__":
    key = jax.random.PRNGKey(0)
    k_graph, k_feat, k_model = jax.random.split(key, 3)

    # Small synthetic heterograph: 2 node types, 3 relation types.
    N = 16
    in_feats = 16
    hidden_feats = 32
    out_feats = 8
    num_layers = 2
    num_bases = 2          # < num_rels=3 -> weight-basis path

    canonical_etypes = {   # etype -> (src_ntype, dst_ntype)
        'cites': ('paper', 'paper'),
        'writes': ('author', 'paper'),
        'written-by': ('paper', 'author'),
    }
    rel_names = sorted(canonical_etypes.keys())

    # Raw {0,1} adjacencies; the right-normalization (norm='right') is applied
    # inside the model in f32, matching DGL GraphConv semantics.
    adjs = {}
    gkeys = jax.random.split(k_graph, len(rel_names))
    for gk, etype in zip(gkeys, rel_names):
        a = (jax.random.uniform(gk, (N, N)) < 0.3).astype(jnp.float32)
        # every dst node has >=1 incoming edge
        a = a.at[jnp.arange(N), jnp.arange(N)].set(1.0)
        adjs[etype] = a

    fk1, fk2 = jax.random.split(k_feat)
    inputs = {
        'paper': jax.random.normal(fk1, (N, in_feats), jnp.float32),
        'author': jax.random.normal(fk2, (N, in_feats), jnp.float32),
    }

    model = EntityClassifyPallas(k_model, rel_names, canonical_etypes,
                                 in_feats, hidden_feats, out_feats,
                                 num_bases, num_layers)

    out = model(adjs, inputs)
    out = jax.tree_util.tree_map(jax.block_until_ready, out)

    ref = reference_forward(model, adjs, inputs)
    for ntype in ref:
        assert out[ntype].shape == (N, out_feats), ntype
        # A is exact {0,1}; normalization + accumulation are f32.  Remaining
        # error is the bf16 feature/basis MXU operands -> tolerance 3e-2.
        assert jnp.allclose(out[ntype], ref[ntype], atol=3e-2, rtol=3e-2), ntype

    print("KERNEL_OK")
</pallas_src>

<mosaic_0001>
module attributes {stable_mosaic.version = 11 : i64} {
  func.func @_hetero_relconv_kernel(%arg0: i32, %arg1: i32, %arg2: i32, %arg3: memref<3xi32, #tpu.memory_space<smem>>, %arg4: memref<3xi32, #tpu.memory_space<smem>>, %arg5: memref<3xi32, #tpu.memory_space<smem>>, %arg6: memref<3xi32, #tpu.memory_space<smem>>, %arg7: memref<3xi32, #tpu.memory_space<smem>>, %arg8: memref<3xi32, #tpu.memory_space<smem>>, %arg9: memref<3xi32, #tpu.memory_space<smem>>, %arg10: memref<1x128x128xbf16, #tpu.memory_space<vmem>>, %arg11: memref<1x128x128xbf16, #tpu.memory_space<vmem>>, %arg12: memref<2x128x128xbf16, #tpu.memory_space<vmem>>, %arg13: memref<1x128xf32, #tpu.memory_space<vmem>>, %arg14: memref<1x128x2xf32, #tpu.memory_space<vmem>>, %arg15: memref<128x128xf32, #tpu.memory_space<vmem>>, %arg16: memref<128x128xf32, #tpu.memory_space<vmem>>, %arg17: memref<2x128x128xf32, #tpu.memory_space<vmem>>) attributes {dimension_semantics = [#tpu.dimension_semantics<parallel>, #tpu.dimension_semantics<arbitrary>, #tpu.dimension_semantics<arbitrary>], iteration_bounds = array<i64: 1, 3, 1>, scalar_prefetch = 7 : i64, scratch_operands = 2 : i64, tpu.core_type = #tpu.core_type<tc>, window_params = [{transform_indices = @transform_0, window_bounds = array<i64: 1, 128, 128>}, {transform_indices = @transform_1, window_bounds = array<i64: 1, 128, 128>}, {pipeline_mode = #tpu.pipeline_mode<synchronous>, transform_indices = @transform_2, window_bounds = array<i64: 2, 128, 128>}, {pipeline_mode = #tpu.pipeline_mode<synchronous>, transform_indices = @transform_3, window_bounds = array<i64: 1, 128>}, {transform_indices = @transform_4, window_bounds = array<i64: 1, 128, 2>}, {transform_indices = @transform_5, window_bounds = array<i64: 128, 128>}]} {
    %0 = arith.index_cast %arg1 : i32 to index
    %1 = memref.load %arg4[%0] : memref<3xi32, #tpu.memory_space<smem>>
    %c0_i32 = arith.constant 0 : i32
    %2 = arith.cmpi eq, %arg1, %c0_i32 : i32
    %c1_i32 = arith.constant 1 : i32
    %3 = arith.subi %arg1, %c1_i32 : i32
    %c0_i32_0 = arith.constant 0 : i32
    %4 = arith.maxsi %3, %c0_i32_0 : i32
    %5 = arith.index_cast %4 : i32 to index
    %6 = memref.load %arg4[%5] : memref<3xi32, #tpu.memory_space<smem>>
    %7 = arith.cmpi ne, %6, %1 : i32
    %8 = arith.ori %2, %7 : i1
    %c2_i32 = arith.constant 2 : i32
    %9 = arith.cmpi eq, %arg1, %c2_i32 : i32
    %c1_i32_1 = arith.constant 1 : i32
    %10 = arith.addi %arg1, %c1_i32_1 : i32
    %c2_i32_2 = arith.constant 2 : i32
    %11 = arith.minsi %10, %c2_i32_2 : i32
    %12 = arith.index_cast %11 : i32 to index
    %13 = memref.load %arg4[%12] : memref<3xi32, #tpu.memory_space<smem>>
    %14 = arith.cmpi ne, %13, %1 : i32
    %15 = arith.ori %9, %14 : i1
    %c3_i32 = arith.constant 3 : i32
    %16 = arith.muli %arg0, %c3_i32 : i32
    %17 = arith.addi %16, %arg1 : i32
    %c1_i32_3 = arith.constant 1 : i32
    %18 = arith.muli %17, %c1_i32_3 : i32
    %19 = arith.addi %18, %arg2 : i32
    %20 = arith.index_cast %19 : i32 to index
    %21 = memref.load %arg5[%20] : memref<3xi32, #tpu.memory_space<smem>>
    %c3_i32_4 = arith.constant 3 : i32
    %22 = arith.muli %arg0, %c3_i32_4 : i32
    %23 = arith.addi %22, %arg1 : i32
    %24 = arith.index_cast %23 : i32 to index
    %25 = memref.load %arg6[%24] : memref<3xi32, #tpu.memory_space<smem>>
    %c0_i32_5 = arith.constant 0 : i32
    %26 = arith.cmpi sgt, %25, %c0_i32_5 : i32
    %c0_i32_6 = arith.constant 0 : i32
    %27 = arith.cmpi eq, %arg2, %c0_i32_6 : i32
    %28 = arith.andi %27, %8 : i1
    %29 = arith.extui %28 : i1 to i32
    %c0_i32_7 = arith.constant 0 : i32
    %30 = arith.cmpi ne, %29, %c0_i32_7 : i32
    scf.if %30 {
      %cst = arith.constant 0.000000e+00 : f32
      %46 = vector.broadcast %cst : f32 to vector<2x128x128xf32>
      %c0 = arith.constant 0 : index
      %c0_16 = arith.constant 0 : index
      %c0_17 = arith.constant 0 : index
      %47 = vector.load %arg17[%c0, %c0_16, %c0_17] : memref<2x128x128xf32, #tpu.memory_space<vmem>>, vector<2x128x128xf32>
      tpu.vector_store %arg17[%c0, %c0_16, %c0_17], %46 {strides = array<i32>} : memref<2x128x128xf32, #tpu.memory_space<vmem>>, vector<2x128x128xf32>,
    } else {
    }
    %c0_i32_8 = arith.constant 0 : i32
    %31 = arith.cmpi eq, %arg2, %c0_i32_8 : i32
    %32 = arith.andi %31, %26 : i1
    %33 = arith.extui %32 : i1 to i32
    %c0_i32_9 = arith.constant 0 : i32
    %34 = arith.cmpi ne, %33, %c0_i32_9 : i32
    scf.if %34 {
      %cst = arith.constant 0.000000e+00 : f32
      %46 = vector.broadcast %cst : f32 to vector<128x128xf32>
      %c0 = arith.constant 0 : index
      %c0_16 = arith.constant 0 : index
      %47 = vector.load %arg16[%c0, %c0_16] : memref<128x128xf32, #tpu.memory_space<vmem>>, vector<128x128xf32>
      tpu.vector_store %arg16[%c0, %c0_16], %46 {strides = array<i32>} : memref<128x128xf32, #tpu.memory_space<vmem>>, vector<128x128xf32>,
    } else {
    }
    %c0_i32_10 = arith.constant 0 : i32
    %35 = arith.cmpi sgt, %21, %c0_i32_10 : i32
    %36 = arith.extui %35 : i1 to i32
    %c0_i32_11 = arith.constant 0 : i32
    %37 = arith.cmpi ne, %36, %c0_i32_11 : i32
    scf.if %37 {
      %c128_i32 = arith.constant 128 : i32
      %46 = arith.muli %arg2, %c128_i32 : i32
      %47 = tpu.assume_multiple %46, 128 : i32
      %c0 = arith.constant 0 : index
      %48 = arith.index_cast %47 : i32 to index
      %c0_16 = arith.constant 0 : index
      %49 = vector.load %arg11[%c0, %48, %c0_16] : memref<1x128x128xbf16, #tpu.memory_space<vmem>>, vector<1x128x128xbf16>
      %50 = vector.shape_cast %49 : vector<1x128x128xbf16> to vector<128x128xbf16>
      %c0_17 = arith.constant 0 : index
      %c0_18 = arith.constant 0 : index
      %51 = vector.load %arg16[%c0_17, %c0_18] : memref<128x128xf32, #tpu.memory_space<vmem>>, vector<128x128xf32>
      %c0_19 = arith.constant 0 : index
      %c0_20 = arith.constant 0 : index
      %c0_21 = arith.constant 0 : index
      %52 = vector.load %arg10[%c0_19, %c0_20, %c0_21] : memref<1x128x128xbf16, #tpu.memory_space<vmem>>, vector<1x128x128xbf16>
      %53 = vector.shape_cast %52 : vector<1x128x128xbf16> to vector<128x128xbf16>
      %cst = arith.constant dense<0.000000e+00> : vector<128x128xf32>
      %54 = tpu.matmul %53, %50, %cst {dimension_numbers = #tpu.dot_dimension_numbers<[1], [0], [0], [1], [0, 0, 1, 1], [], []>} : vector<128x128xbf16>, vector<128x128xbf16>, vector<128x128xf32> -> vector<128x128xf32>
      %55 = arith.addf %51, %54 : vector<128x128xf32>
      %c0_22 = arith.constant 0 : index
      %c0_23 = arith.constant 0 : index
      %56 = vector.load %arg16[%c0_22, %c0_23] : memref<128x128xf32, #tpu.memory_space<vmem>>, vector<128x128xf32>
      tpu.vector_store %arg16[%c0_22, %c0_23], %55 {strides = array<i32>} : memref<128x128xf32, #tpu.memory_space<vmem>>, vector<128x128xf32>,
    } else {
    }
    %c0_i32_12 = arith.constant 0 : i32
    %38 = arith.cmpi eq, %arg2, %c0_i32_12 : i32
    %39 = arith.andi %38, %26 : i1
    %40 = arith.extui %39 : i1 to i32
    %c0_i32_13 = arith.constant 0 : i32
    %41 = arith.cmpi ne, %40, %c0_i32_13 : i32
    scf.if %41 {
      %c0 = arith.constant 0 : index
      %c0_16 = arith.constant 0 : index
      %46 = vector.load %arg16[%c0, %c0_16] : memref<128x128xf32, #tpu.memory_space<vmem>>, vector<128x128xf32>
      %c0_17 = arith.constant 0 : index
      %c0_18 = arith.constant 0 : index
      %c0_19 = arith.constant 0 : index
      %47 = vector.load %arg17[%c0_17, %c0_18, %c0_19] : memref<2x128x128xf32, #tpu.memory_space<vmem>>, vector<1x128x128xf32>
      %48 = vector.shape_cast %47 : vector<1x128x128xf32> to vector<128x128xf32>
      %c0_20 = arith.constant 0 : index
      %c0_21 = arith.constant 0 : index
      %c0_22 = arith.constant 0 : index
      %49 = vector.load %arg14[%c0_20, %c0_21, %c0_22] : memref<1x128x2xf32, #tpu.memory_space<vmem>>, vector<1x128x1xf32>
      %50 = vector.shape_cast %49 : vector<1x128x1xf32> to vector<128x1xf32>
      %51 = vector.broadcast %50 : vector<128x1xf32> to vector<128x128xf32>
      %52 = arith.mulf %46, %51 : vector<128x128xf32>
      %53 = arith.addf %48, %52 : vector<128x128xf32>
      %c0_23 = arith.constant 0 : index
      %c0_24 = arith.constant 0 : index
      %c0_25 = arith.constant 0 : index
      %54 = vector.load %arg17[%c0_23, %c0_24, %c0_25] : memref<2x128x128xf32, #tpu.memory_space<vmem>>, vector<1x128x128xf32>
      %55 = vector.shape_cast %54 : vector<1x128x128xf32> to vector<128x128xf32>
      %56 = vector.shape_cast %53 : vector<128x128xf32> to vector<1x128x128xf32>
      tpu.vector_store %arg17[%c0_23, %c0_24, %c0_25], %56 {strides = array<i32>} : memref<2x128x128xf32, #tpu.memory_space<vmem>>, vector<1x128x128xf32>,
      %c1 = arith.constant 1 : index
      %c0_26 = arith.constant 0 : index
      %c0_27 = arith.constant 0 : index
      %57 = vector.load %arg17[%c1, %c0_26, %c0_27] : memref<2x128x128xf32, #tpu.memory_space<vmem>>, vector<1x128x128xf32>
      %58 = vector.shape_cast %57 : vector<1x128x128xf32> to vector<128x128xf32>
      %c0_28 = arith.constant 0 : index
      %c0_29 = arith.constant 0 : index
      %c1_30 = arith.constant 1 : index
      %59 = vector.load %arg14[%c0_28, %c0_29, %c1_30] : memref<1x128x2xf32, #tpu.memory_space<vmem>>, vector<1x128x1xf32>
      %60 = vector.shape_cast %59 : vector<1x128x1xf32> to vector<128x1xf32>
      %61 = vector.broadcast %60 : vector<128x1xf32> to vector<128x128xf32>
      %62 = arith.mulf %46, %61 : vector<128x128xf32>
      %63 = arith.addf %58, %62 : vector<128x128xf32>
      %c1_31 = arith.constant 1 : index
      %c0_32 = arith.constant 0 : index
      %c0_33 = arith.constant 0 : index
      %64 = vector.load %arg17[%c1_31, %c0_32, %c0_33] : memref<2x128x128xf32, #tpu.memory_space<vmem>>, vector<1x128x128xf32>
      %65 = vector.shape_cast %64 : vector<1x128x128xf32> to vector<128x128xf32>
      %66 = vector.shape_cast %63 : vector<128x128xf32> to vector<1x128x128xf32>
      tpu.vector_store %arg17[%c1_31, %c0_32, %c0_33], %66 {strides = array<i32>} : memref<2x128x128xf32, #tpu.memory_space<vmem>>, vector<1x128x128xf32>,
    } else {
    }
    %c0_i32_14 = arith.constant 0 : i32
    %42 = arith.cmpi eq, %arg2, %c0_i32_14 : i32
    %43 = arith.andi %42, %15 : i1
    %44 = arith.extui %43 : i1 to i32
    %c0_i32_15 = arith.constant 0 : i32
    %45 = arith.cmpi ne, %44, %c0_i32_15 : i32
    scf.if %45 {
      %c0 = arith.constant 0 : index
      %c0_16 = arith.constant 0 : index
      %c0_17 = arith.constant 0 : index
      %46 = vector.load %arg17[%c0, %c0_16, %c0_17] : memref<2x128x128xf32, #tpu.memory_space<vmem>>, vector<1x128x128xf32>
      %47 = vector.shape_cast %46 : vector<1x128x128xf32> to vector<128x128xf32>
      %48 = arith.truncf %47 : vector<128x128xf32> to vector<128x128xbf16>
      %c0_18 = arith.constant 0 : index
      %c0_19 = arith.constant 0 : index
      %c0_20 = arith.constant 0 : index
      %49 = vector.load %arg12[%c0_18, %c0_19, %c0_20] : memref<2x128x128xbf16, #tpu.memory_space<vmem>>, vector<1x128x128xbf16>
      %50 = vector.shape_cast %49 : vector<1x128x128xbf16> to vector<128x128xbf16>
      %cst = arith.constant dense<0.000000e+00> : vector<128x128xf32>
      %51 = tpu.matmul %48, %50, %cst {dimension_numbers = #tpu.dot_dimension_numbers<[1], [0], [0], [1], [0, 0, 1, 1], [], []>} : vector<128x128xbf16>, vector<128x128xbf16>, vector<128x128xf32> -> vector<128x128xf32>
      %c1 = arith.constant 1 : index
      %c0_21 = arith.constant 0 : index
      %c0_22 = arith.constant 0 : index
      %52 = vector.load %arg17[%c1, %c0_21, %c0_22] : memref<2x128x128xf32, #tpu.memory_space<vmem>>, vector<1x128x128xf32>
      %53 = vector.shape_cast %52 : vector<1x128x128xf32> to vector<128x128xf32>
      %54 = arith.truncf %53 : vector<128x128xf32> to vector<128x128xbf16>
      %c1_23 = arith.constant 1 : index
      %c0_24 = arith.constant 0 : index
      %c0_25 = arith.constant 0 : index
      %55 = vector.load %arg12[%c1_23, %c0_24, %c0_25] : memref<2x128x128xbf16, #tpu.memory_space<vmem>>, vector<1x128x128xbf16>
      %56 = vector.shape_cast %55 : vector<1x128x128xbf16> to vector<128x128xbf16>
      %cst_26 = arith.constant dense<0.000000e+00> : vector<128x128xf32>
      %57 = tpu.matmul %54, %56, %cst_26 {dimension_numbers = #tpu.dot_dimension_numbers<[1], [0], [0], [1], [0, 0, 1, 1], [], []>} : vector<128x128xbf16>, vector<128x128xbf16>, vector<128x128xf32> -> vector<128x128xf32>
      %58 = arith.addf %51, %57 : vector<128x128xf32>
      %c0_27 = arith.constant 0 : index
      %c0_28 = arith.constant 0 : index
      %59 = vector.load %arg13[%c0_27, %c0_28] : memref<1x128xf32, #tpu.memory_space<vmem>>, vector<1x128xf32>
      %60 = vector.broadcast %59 : vector<1x128xf32> to vector<128x128xf32>
      %61 = arith.addf %58, %60 : vector<128x128xf32>
      %c0_29 = arith.constant 0 : index
      %c0_30 = arith.constant 0 : index
      %62 = vector.load %arg15[%c0_29, %c0_30] : memref<128x128xf32, #tpu.memory_space<vmem>>, vector<128x128xf32>
      tpu.vector_store %arg15[%c0_29, %c0_30], %61 {strides = array<i32>} : memref<128x128xf32, #tpu.memory_space<vmem>>, vector<128x128xf32>,
    } else {
    }
    return
  }
  func.func @transform_0(%arg0: i32, %arg1: i32, %arg2: i32, %arg3: memref<3xi32, #tpu.memory_space<smem>>, %arg4: memref<3xi32, #tpu.memory_space<smem>>, %arg5: memref<3xi32, #tpu.memory_space<smem>>, %arg6: memref<3xi32, #tpu.memory_space<smem>>, %arg7: memref<3xi32, #tpu.memory_space<smem>>, %arg8: memref<3xi32, #tpu.memory_space<smem>>, %arg9: memref<3xi32, #tpu.memory_space<smem>>) -> (i32, i32, i32) {
    %c3_i32 = arith.constant 3 : i32
    %0 = arith.muli %arg0, %c3_i32 : i32
    %1 = arith.addi %0, %arg1 : i32
    %c1_i32 = arith.constant 1 : i32
    %2 = arith.muli %1, %c1_i32 : i32
    %3 = arith.addi %2, %arg2 : i32
    %4 = arith.index_cast %3 : i32 to index
    %5 = memref.load %arg7[%4] : memref<3xi32, #tpu.memory_space<smem>>
    %6 = arith.index_cast %3 : i32 to index
    %7 = memref.load %arg8[%6] : memref<3xi32, #tpu.memory_space<smem>>
    %8 = arith.index_cast %3 : i32 to index
    %9 = memref.load %arg9[%8] : memref<3xi32, #tpu.memory_space<smem>>
    %c0_i32 = arith.constant 0 : i32
    return %5, %7, %9 : i32, i32, i32
  }
  func.func @transform_1(%arg0: i32, %arg1: i32, %arg2: i32, %arg3: memref<3xi32, #tpu.memory_space<smem>>, %arg4: memref<3xi32, #tpu.memory_space<smem>>, %arg5: memref<3xi32, #tpu.memory_space<smem>>, %arg6: memref<3xi32, #tpu.memory_space<smem>>, %arg7: memref<3xi32, #tpu.memory_space<smem>>, %arg8: memref<3xi32, #tpu.memory_space<smem>>, %arg9: memref<3xi32, #tpu.memory_space<smem>>) -> (i32, i32, i32) {
    %0 = arith.index_cast %arg1 : i32 to index
    %1 = memref.load %arg3[%0] : memref<3xi32, #tpu.memory_space<smem>>
    %c0_i32 = arith.constant 0 : i32
    %c0_i32_0 = arith.constant 0 : i32
    %c0_i32_1 = arith.constant 0 : i32
    return %1, %c0_i32, %c0_i32_0 : i32, i32, i32
  }
  func.func @transform_2(%arg0: i32, %arg1: i32, %arg2: i32, %arg3: memref<3xi32, #tpu.memory_space<smem>>, %arg4: memref<3xi32, #tpu.memory_space<smem>>, %arg5: memref<3xi32, #tpu.memory_space<smem>>, %arg6: memref<3xi32, #tpu.memory_space<smem>>, %arg7: memref<3xi32, #tpu.memory_space<smem>>, %arg8: memref<3xi32, #tpu.memory_space<smem>>, %arg9: memref<3xi32, #tpu.memory_space<smem>>) -> (i32, i32, i32) {
    %c0_i32 = arith.constant 0 : i32
    %c0_i32_0 = arith.constant 0 : i32
    %c0_i32_1 = arith.constant 0 : i32
    %c0_i32_2 = arith.constant 0 : i32
    return %c0_i32, %c0_i32_0, %c0_i32_1 : i32, i32, i32
  }
  func.func @transform_3(%arg0: i32, %arg1: i32, %arg2: i32, %arg3: memref<3xi32, #tpu.memory_space<smem>>, %arg4: memref<3xi32, #tpu.memory_space<smem>>, %arg5: memref<3xi32, #tpu.memory_space<smem>>, %arg6: memref<3xi32, #tpu.memory_space<smem>>, %arg7: memref<3xi32, #tpu.memory_space<smem>>, %arg8: memref<3xi32, #tpu.memory_space<smem>>, %arg9: memref<3xi32, #tpu.memory_space<smem>>) -> (i32, i32) {
    %c0_i32 = arith.constant 0 : i32
    %c0_i32_0 = arith.constant 0 : i32
    %c0_i32_1 = arith.constant 0 : i32
    return %c0_i32, %c0_i32_0 : i32, i32
  }
  func.func @transform_4(%arg0: i32, %arg1: i32, %arg2: i32, %arg3: memref<3xi32, #tpu.memory_space<smem>>, %arg4: memref<3xi32, #tpu.memory_space<smem>>, %arg5: memref<3xi32, #tpu.memory_space<smem>>, %arg6: memref<3xi32, #tpu.memory_space<smem>>, %arg7: memref<3xi32, #tpu.memory_space<smem>>, %arg8: memref<3xi32, #tpu.memory_space<smem>>, %arg9: memref<3xi32, #tpu.memory_space<smem>>) -> (i32, i32, i32) {
    %c0_i32 = arith.constant 0 : i32
    %c0_i32_0 = arith.constant 0 : i32
    return %arg1, %arg0, %c0_i32 : i32, i32, i32
  }
  func.func @transform_5(%arg0: i32, %arg1: i32, %arg2: i32, %arg3: memref<3xi32, #tpu.memory_space<smem>>, %arg4: memref<3xi32, #tpu.memory_space<smem>>, %arg5: memref<3xi32, #tpu.memory_space<smem>>, %arg6: memref<3xi32, #tpu.memory_space<smem>>, %arg7: memref<3xi32, #tpu.memory_space<smem>>, %arg8: memref<3xi32, #tpu.memory_space<smem>>, %arg9: memref<3xi32, #tpu.memory_space<smem>>) -> (i32, i32) {
    %0 = arith.index_cast %arg1 : i32 to index
    %1 = memref.load %arg4[%0] : memref<3xi32, #tpu.memory_space<smem>>
    %c1_i32 = arith.constant 1 : i32
    %2 = arith.muli %1, %c1_i32 : i32
    %3 = arith.addi %2, %arg0 : i32
    %c0_i32 = arith.constant 0 : i32
    %c0_i32_0 = arith.constant 0 : i32
    return %3, %c0_i32 : i32, i32
  }
}

</mosaic_0001>

<bundles_post_ra>
// kernel: tpu_custom_call.1
= control target key start
LH: loop header
LB: loop body
LE: loop exit
PB: predicated region body
PF: predicated region fallthrough
CT: control target
= control target key end

     0   :  { %s2074_s27 = smov [#allocation5]   ;;  %s2075_s28 = smov [#allocation6]   ;;  %s2475_s0 = inlined_call_operand.vmem [shape: s32[3], index: 0, kind: input, shape index: {}]   ;;  %s2476_s7 = inlined_call_operand.vmem [shape: bf16[3,128,128], index: 7, kind: input, shape index: {}]   ;;  %s2477_s8 = inlined_call_operand.vmem [shape: bf16[2,128,128], index: 8, kind: input, shape index: {}]   ;;  %s2478_s9 = inlined_call_operand.hbm [shape: bf16[2,128,128], index: 9, kind: input, shape index: {}]   ;;  %s2479_s10 = inlined_call_operand.vmem [shape: f32[1,128], index: 10, kind: input, shape index: {}]   ;;  %s2480_s11 = inlined_call_operand.vmem [shape: f32[3,128,2], index: 11, kind: input, shape index: {}]   ;;  %s2481_s12 = inlined_call_operand.hbm [shape: f32[256,128], index: 12, kind: output, shape index: {}]   ;;  %s2482_s1 = inlined_call_operand.vmem [shape: s32[3], index: 1, kind: input, shape index: {}]   ;;  %s2483_s2 = inlined_call_operand.vmem [shape: s32[3], index: 2, kind: input, shape index: {}]   ;;  %s2484_s3 = inlined_call_operand.vmem [shape: s32[3], index: 3, kind: input, shape index: {}]   ;;  %s2485_s4 = inlined_call_operand.vmem [shape: s32[3], index: 4, kind: input, shape index: {}]   ;;  %s2486_s5 = inlined_call_operand.vmem [shape: s32[3], index: 5, kind: input, shape index: {}]   ;;  %s2487_s6 = inlined_call_operand.vmem [shape: s32[3], index: 6, kind: input, shape index: {}]  }
   0x1   :  { %2491 = sst [smem:[#allocation24_spill]] %s2478_s9  ;;  %s18_s23 = sshll.u32 %s2475_s0, 4  ;;  %s19_s23 = int_to_ptr.vmem [resolvable:$true] %s18_s23 }
   0x2   :  { %s23_s26 = sshll.u32 %s2482_s1, 4  ;;  %s28_s13 = sshll.u32 %s2483_s2, 4  ;;  %s24_s26 = int_to_ptr.vmem [resolvable:$true] %s23_s26  ;;  %s29_s13 = int_to_ptr.vmem [resolvable:$true] %s28_s13 }
   0x3   :  { %21 = dma.vmem_to_smem %s19_s23, 16, %s2074_s27, [#allocation4] }
   0x4   :  { %26 = dma.vmem_to_smem %s24_s26, 16, %s2075_s28, [#allocation4] }
   0x5   :  { %s33_s16 = sshll.u32 %s2484_s3, 4  ;;  %s2076_s0 = smov [#allocation7]   ;;  %s34_s16 = int_to_ptr.vmem [resolvable:$true] %s33_s16 }
   0x6   :  { %31 = dma.vmem_to_smem %s29_s13, 16, %s2076_s0, [#allocation4] }
   0x7   :  { %s2077_s17 = smov [#allocation8]   ;;  %s38_s19 = sshll.u32 %s2485_s4, 4  ;;  %s39_s19 = int_to_ptr.vmem [resolvable:$true] %s38_s19 }
   0x8   :  { %36 = dma.vmem_to_smem %s34_s16, 16, %s2077_s17, [#allocation4] }
   0x9   :  { %s43_s22 = sshll.u32 %s2486_s5, 4  ;;  %s2078_s2 = smov [#allocation9]   ;;  %s44_s22 = int_to_ptr.vmem [resolvable:$true] %s43_s22 }
   0xa   :  { %41 = dma.vmem_to_smem %s39_s19, 16, %s2078_s2, [#allocation4] }
   0xb   :  { %s2079_s23 = smov [#allocation10]   ;;  %s48_s25 = sshll.u32 %s2487_s6, 4  ;;  %s49_s25 = int_to_ptr.vmem [resolvable:$true] %s48_s25 }
   0xc   :  { %46 = dma.vmem_to_smem %s44_s22, 16, %s2079_s23, [#allocation4] }
   0xd   :  { %s2080_s26 = smov [#allocation11]  }
   0xe   :  { %51 = dma.vmem_to_smem %s49_s25, 16, %s2080_s26, [#allocation4] }
   0xf   :  { %2040 = dma.done.wait [#allocation4], 112 }
  0x10   :  { %2041 = vsyncadd [#allocation4], 4294967184 }
  0x11   :  { %54 = sfence }
  0x12   :  { %55 = vsyncpa [#allocation13], 0 }
  0x13   :  { %56 = vsyncpa [#allocation14], 0 }
  0x14   :  { %58 = vsyncpa [#allocation14 + $0x1], 0  ;;  %s2176_s4 = smov 0   ;;  %s2178_s5 = smov 0  }
  0x15   :  { %s2180_s27 = smov 0   ;;  %s2182_s28 = smov 0  }
  0x16   :  { %s2184_s29 = smov 0   ;;  %s2186_s6 = smov 0  }
  0x17 LB: > { %2492 = sst [smem:[#allocation20_spill]] %s2060_s27  ;;  %s1555_s30 = sadd.s32 4294967295, %s2072_s6   ;;  %s2072_s6 = sphi %s2186_s6, %s64_s6   ;;  %s2068_s29 = sphi %s2184_s29, %s2509_s29   ;;  %s2064_s28 = sphi %s2182_s28, %s2508_s28   ;;  %s2060_s27 = sphi %s2180_s27, %s2507_s27   ;;  %s2056_s5 = sphi %s2178_s5, %s2511_s5   ;;  %s2052_s4 = sphi %s2176_s4, %s2510_s4  }
  0x18   : > { %2493 = sst [smem:[#allocation21_spill]] %s2068_s29  ;;  %s1556_s13 = sadd.s32 4294967294, %s2072_s6  }
  0x19   : > { %s79_s14 = sadd.s32 1, %s2068_s29  ;;  %s227_s15 = sld [smem:[#allocation6 + %s2068_s29]] }
  0x1a   : > { %p81_p0 = scmp.ge.s32.totalorder %s79_s14, 3  ;;  %s234_s16 = sadd.s32 1, %s2060_s27 }
  0x1b   : > { %p244_p1 = scmp.ne.s32.totalorder %s2060_s27, %s2056_s5  ;;  %p245_p2 = scmp.eq.s32.totalorder %s1555_s30, 2 }
  0x1c   : > { %s2513_s14 = smov (%p81_p0, %s79_s14), 0  ;;  %p250_p4 = scmp.ne.s32.totalorder %s2056_s5, %s2052_s4 }
  0x1d   : > { %2494 = sst [smem:[#allocation22_spill]] %s2513_s14  ;;  %p2215_p3 = por %p245_p2, %p244_p1 }
  0x1e   : > { %s229_s17 = sld [smem:[#allocation6 + %s2513_s14]]  ;;  %p251_p5 = scmp.eq.s32.totalorder %s1556_s13, 2 }
  0x1f   : > { %p1557_p6 = scmp.ge.s32.totalorder %s2072_s6, 1  ;;  %p258_p7 = scmp.lt.s32.totalorder %s2072_s6, 4 }
  0x20   : > { %p2224_p8 = por %p251_p5, %p250_p4  ;;  %p2232_p10 = scmp.eq.s32.totalorder %s1555_s30, 0 }
  0x21   : > { %p2228_p9 = pnand %p1557_p6, %p258_p7  ;;  %s2499_s9 = sld [smem:[#allocation24_spill]] }
  0x22   : > { %s2081_s23 = smov [#allocation12]   ;;  %s2082_s25 = smov 64  }
  0x23   : > { %p1792_p11 = pneg %p2228_p9  ;;  %s271_s3 = sshll.u32 %s2081_s23, 4  ;;  %s272_s3 = int_to_ptr.vmem [resolvable:$true] %s271_s3 }
  0x24   : > { %s231_s2 = ssub.s32 %s227_s15, %s229_s17  ;;  %s2083_s26 = smov 4  }
  0x25   : > { %p232_p12 = scmp.eq.s32.totalorder %s231_s2, 0  ;;  %p1793_p13 = pnand %p2232_p10, %p1792_p11 }
  0x26   : > { %341 = sbr.rel (%p2228_p9) target bundleno = 765 (0x2fd), region = 40 }
  0x27   : > { %s269_s22 = sshll.u32 %s2499_s9, 4  ;;  %s270_s22 = int_to_ptr.hbm [resolvable:$true] %s269_s22 }
  0x28   : > { %s2244_s24 = scalar_select %p232_p12, %s2060_s27, %s234_s16  }
  0x29   : > { %1795 = dma.hbm_to_vmem [thread:$0]  (!%p1793_p13), %s270_s22, 2048, %s272_s3, [#allocation13], %s2082_s25, %s2082_s25, %s2083_s26  }
  0x2a   : > { %2500 = sst [smem:[#allocation23_spill]] %s2244_s24 }
  0x2b   : > { %2043 = dma.done.wait (%p2232_p10), [#allocation13], 2048  }
  0x2c   : > { %2045 = vsyncadd (%p2232_p10), [#allocation13], 4294965248  ;;  %s1570_s30 = sadd.s32 4294967295, %s2064_s28  ;;  %s401_s13 = sld [smem:[#allocation9 + %s2064_s28]] }
  0x2d   : > { %p444_p0 = scmp.eq.s32.totalorder %s2064_s28, 0  ;;  %s402_s15 = sld [smem:[#allocation10 + %s2064_s28]] }
  0x2e   : > { %p446_p1 = scmp.gt.s32.totalorder %s1570_s30, 0  ;;  %s403_s16 = sld [smem:[#allocation11 + %s2064_s28]] }
  0x2f   : > { %s452_s17 = sadd.s32 1, %s2064_s28  ;;  %s423_s18 = sld [smem:[#allocation5 + %s2064_s28]] }
  0x30   : > { %p2259_p2 = scmp.lt.s32.totalorder %s452_s17, 2  ;;  %s2264_s20 = sld [smem:[#allocation6 + %s2064_s28]] }
  0x31   : > { %s2515_s30 = smov (!%p446_p1, %s1570_s30), 0  ;;  %s2268_s22 = sld [smem:[#allocation7 + %s2064_s28]] }
  0x32   : > { %p405_p4 = scmp.lt.s32.totalorder %s401_s13, 2  ;;  %s448_s23 = sld [smem:[#allocation6 + %s2515_s30]] }
  0x33   : > { %s1563_s2 = sshll.u32 %s402_s15, 4  ;;  %s2525_s17 = smov (!%p2259_p2, %s452_s17), 2 }
  0x34   : > { %s2517_s13 = smov (!%p405_p4, %s401_s13), 2  ;;  %p407_p5 = scmp.lt.s32.totalorder %s1563_s2, 15 }
  0x35   : > { %p409_p6 = scmp.lt.s32.totalorder %s403_s16, 0  ;;  %s1564_s3 = sshll.u32 %s2517_s13, 4 }
  0x36   : > { %p424_p7 = scmp.lt.s32.totalorder %s423_s18, 1  ;;  %s2519_s2 = smov (!%p407_p5, %s1563_s2), 15 }
  0x37   : > { %s2521_s16 = smov (!%p409_p6, %s403_s16), 0  ;;  %s455_s9 = sld [smem:[#allocation6 + %s2525_s17]] }
  0x38   : > { %s2523_s18 = smov (!%p424_p7, %s423_s18), 1  ;;  %s411_s25 = sadd.s32 %s2521_s16, %s2519_s2 }
  0x39   : > { %p449_p9 = scmp.ne.s32.totalorder %s448_s23, %s2264_s20  ;;  %s413_s26 = sadd.s32 %s1564_s3, %s411_s25 }
  0x3a   : > { %s1708_s30 = sshll.u32 %s2523_s18, 6  ;;  %s1565_s15 = sshll.u32 %s413_s26, 2 }
  0x3b   : > { %s2274_s14 = scalar_lea.vmem %s2477_s8, %s1708_s30  ;;  %s2279_s24 = scalar_lea.vmem %s2476_s7, %s1565_s15 }
  0x3c   : > { %p2283_p10 = por %p449_p9, %p444_p0  ;;  %s2290_s16 = sld [smem:[#allocation8 + %s2064_s28]] }
  0x3d   : > { %s2503_s18 = sand.u32 1, %s2056_s5   ;;  %p431_p11 = scmp.lt.s32.totalorder %s2064_s28, 2  ;;  %v2084_v0 = vmov (%p2283_p10), 0.0  }
  0x3e   : > { %s1562_s2 = sshll.u32 %s2503_s18, 7  ;;  %p451_p12 = scmp.eq.s32.totalorder %s2064_s28, 2  ;;  %469 = vst [vmem:[#allocation3 + $0xa8] sm:$0xff] (%p2283_p10), %v2084_v0 }
  0x3f   : > { %s432_s21 = scalar_select %p431_p11, %s2064_s28, 2  ;;  %470 = vst [vmem:[#allocation3 + $0x68] sm:$0xff] (%p2283_p10), %v2084_v0 }
  0x40   : > { %p456_p1 = scmp.ne.s32.totalorder %s455_s9, %s2264_s20  ;;  %s2308_s26 = scalar_lea.vmem [#allocation15], %s1562_s2  ;;  %471 = vst [vmem:[#allocation3 + $0x10] sm:$0xff] (%p2283_p10), %v2084_v0 }
  0x41   : > { %s1709_s29 = sshll.u32 %s432_s21, 7  ;;  %468 = sbr.rel (!%p2283_p10) target bundleno = 94 (0x5e), region = 48  ;;  %472 = vst [vmem:[#allocation3 + $0xc0] sm:$0xff] (%p2283_p10), %v2084_v0 }
  0x42   : > { %p463_p13 = scmp.gt.s32.totalorder %s2290_s16, 0  ;;  %s2302_s25 = scalar_lea.vmem %s2480_s11, %s1709_s29  ;;  %473 = vst [vmem:[#allocation3 + $0xc8] sm:$0xff] (%p2283_p10), %v2084_v0 }
  0x43   : > { %p2304_p0 = por %p456_p1, %p451_p12  ;;  %474 = vst [vmem:[#allocation3 + $0xb0] sm:$0xff] (%p2283_p10), %v2084_v0 }
  0x44   : > { %475 = vst [vmem:[#allocation3 + $0x70] sm:$0xff] (%p2283_p10), %v2084_v0 }
  0x45   : > { %476 = vst [vmem:[#allocation3 + $0x38] sm:$0xff] (%p2283_p10), %v2084_v0 }
  0x46   : > { %477 = vst [vmem:[#allocation3 + $0x48] sm:$0xff] %v2084_v0 }
  0x47   : > { %478 = vst [vmem:[#allocation3 + $0xf8] sm:$0xff] %v2084_v0 }
  0x48   : > { %479 = vst [vmem:[#allocation3 + $0x78] sm:$0xff] %v2084_v0 }
  0x49   : > { %480 = vst [vmem:[#allocation3 + $0x88] sm:$0xff] %v2084_v0 }
  0x4a   : > { %481 = vst [vmem:[#allocation3 + $0xf0] sm:$0xff] %v2084_v0 }
  0x4b   : > { %482 = vst [vmem:[#allocation3 + $0x18] sm:$0xff] %v2084_v0 }
  0x4c   : > { %483 = vst [vmem:[#allocation3 + $0x30] sm:$0xff] %v2084_v0 }
  0x4d   : > { %484 = vst [vmem:[#allocation3 + $0x50] sm:$0xff] %v2084_v0 }
  0x4e   : > { %485 = vst [vmem:[#allocation3 + $0xb8] sm:$0xff] %v2084_v0 }
  0x4f   : > { %486 = vst [vmem:[#allocation3 + $0xd0] sm:$0xff] %v2084_v0 }
  0x50   : > { %487 = vst [vmem:[#allocation3 + $0xd8] sm:$0xff] %v2084_v0 }
  0x51   : > { %488 = vst [vmem:[#allocation3 + $0x58] sm:$0xff] %v2084_v0 }
  0x52   : > { %489 = vst [vmem:[#allocation3 + $0x80] sm:$0xff] %v2084_v0 }
  0x53   : > { %490 = vst [vmem:[#allocation3 + $0x40] sm:$0xff] %v2084_v0 }
  0x54   : > { %491 = vst [vmem:[#allocation3 + $0x28] sm:$0xff] %v2084_v0 }
  0x55   : > { %492 = vst [vmem:[#allocation3] sm:$0xff] %v2084_v0 }
  0x56   : > { %493 = vst [vmem:[#allocation3 + $0x90] sm:$0xff] %v2084_v0 }
  0x57   : > { %494 = vst [vmem:[#allocation3 + $0xe8] sm:$0xff] %v2084_v0 }
  0x58   : > { %495 = vst [vmem:[#allocation3 + $0xa0] sm:$0xff] %v2084_v0 }
  0x59   : > { %496 = vst [vmem:[#allocation3 + $0x20] sm:$0xff] %v2084_v0 }
  0x5a   : > { %497 = vst [vmem:[#allocation3 + $0x8] sm:$0xff] %v2084_v0 }
  0x5b   : > { %498 = vst [vmem:[#allocation3 + $0xe0] sm:$0xff] %v2084_v0 }
  0x5c   : > { %499 = vst [vmem:[#allocation3 + $0x60] sm:$0xff] %v2084_v0 }
  0x5d   : > { %500 = vst [vmem:[#allocation3 + $0x98] sm:$0xff] %v2084_v0 }
  0x5e PF: > { %504 = sbr.rel (!%p463_p13) target bundleno = 111 (0x6f), region = 52  ;;  %v2085_v1 = vmov (%p463_p13), 0.0  }
  0x5f   : > { %505 = vst [vmem:[#allocation2 + $0x30] sm:$0xff] (%p463_p13), %v2085_v1 }
  0x60   : > { %506 = vst [vmem:[#allocation2] sm:$0xff] (%p463_p13), %v2085_v1 }
  0x61   : > { %507 = vst [vmem:[#allocation2 + $0x58] sm:$0xff] (%p463_p13), %v2085_v1 }
  0x62   : > { %508 = vst [vmem:[#allocation2 + $0x18] sm:$0xff] (%p463_p13), %v2085_v1 }
  0x63   : > { %509 = vst [vmem:[#allocation2 + $0x50] sm:$0xff] %v2085_v1 }
  0x64   : > { %510 = vst [vmem:[#allocation2 + $0x68] sm:$0xff] %v2085_v1 }
  0x65   : > { %511 = vst [vmem:[#allocation2 + $0x8] sm:$0xff] %v2085_v1 }
  0x66   : > { %512 = vst [vmem:[#allocation2 + $0x48] sm:$0xff] %v2085_v1 }
  0x67   : > { %513 = vst [vmem:[#allocation2 + $0x40] sm:$0xff] %v2085_v1 }
  0x68   : > { %514 = vst [vmem:[#allocation2 + $0x20] sm:$0xff] %v2085_v1 }
  0x69   : > { %515 = vst [vmem:[#allocation2 + $0x10] sm:$0xff] %v2085_v1 }
  0x6a   : > { %516 = vst [vmem:[#allocation2 + $0x38] sm:$0xff] %v2085_v1 }
  0x6b   : > { %517 = vst [vmem:[#allocation2 + $0x60] sm:$0xff] %v2085_v1 }
  0x6c   : > { %518 = vst [vmem:[#allocation2 + $0x70] sm:$0xff] %v2085_v1 }
  0x6d   : > { %519 = vst [vmem:[#allocation2 + $0x78] sm:$0xff] %v2085_v1 }
  0x6e   : > { %520 = vst [vmem:[#allocation2 + $0x28] sm:$0xff] %v2085_v1 }
  0x6f PF: > { %p1573_p2 = scmp.le.s32.totalorder %s2268_s22, 0 }
  0x71   : > { %524 = sbr.rel (%p1573_p2) target bundleno = 311 (0x137), region = 56 }
  0x76   : > { %v1718_v2 = vld [vmem:[%s2274_s14 + $0x38] sm:$0xff]  ;;  %v1717_v3 = vld [vmem:[%s2274_s14 + $0x30] sm:$0xff]  ;;  %v1716_v4 = vld [vmem:[%s2274_s14 + $0x28] sm:$0xff] }
  0x77   : > { %674 = vmatpush.bf16.msra.mxu0 %v1718_v2  ;;  %1744 = vmatpush.bf16.msra.mxu1 %v1718_v2  ;;  %v1715_v5 = vld [vmem:[%s2274_s14 + $0x20] sm:$0xff]  ;;  %v1714_v6 = vld [vmem:[%s2274_s14 + $0x18] sm:$0xff]  ;;  %v1713_v7 = vld [vmem:[%s2274_s14 + $0x10] sm:$0xff] }
  0x78   : > { %1745 = vmatpush.bf16.msra.mxu2 %v1718_v2  ;;  %1746 = vmatpush.bf16.msra.mxu3 %v1718_v2  ;;  %v1712_v8 = vld [vmem:[%s2274_s14 + $0x8] sm:$0xff]  ;;  %v1711_v9 = vld [vmem:[%s2274_s14] sm:$0xff]  ;;  %v1721_v11 = vld [vmem:[%s2279_s24 + $0x10] sm:$0xff] }
  0x79   : > { %v1719_v10 = vld [vmem:[%s2279_s24] sm:$0xff]  ;;  %v1725_v13 = vld [vmem:[%s2279_s24 + $0x30] sm:$0xff]  ;;  %v1720_v14 = vld [vmem:[%s2279_s24 + $0x8] sm:$0xff] }
  0x7a   : > { %v1723_v12 = vld [vmem:[%s2279_s24 + $0x20] sm:$0xff]  ;;  %v1722_v15 = vld [vmem:[%s2279_s24 + $0x18] sm:$0xff]  ;;  %v1724_v16 = vld [vmem:[%s2279_s24 + $0x28] sm:$0xff] }
  0x7b   : > { %675 = vmatpush.bf16.msra.mxu0 %v1717_v3  ;;  %1747 = vmatpush.bf16.msra.mxu1 %v1717_v3  ;;  %v1726_v17 = vld [vmem:[%s2279_s24 + $0x38] sm:$0xff]  ;;  %v546_v18 = vld [vmem:[#allocation2 + $0x30] sm:$0xff]  ;;  %v554_v24 = vld [vmem:[#allocation2 + $0x40] sm:$0xff] }
  0x7c   : > { %1748 = vmatpush.bf16.msra.mxu2 %v1717_v3  ;;  %1749 = vmatpush.bf16.msra.mxu3 %v1717_v3  ;;  %v550_v19 = vld [vmem:[#allocation2 + $0x50] sm:$0xff]  ;;  %v558_v25 = vld [vmem:[#allocation2 + $0x60] sm:$0xff]  ;;  %v551_v27 = vld [vmem:[#allocation2 + $0x68] sm:$0xff] }
  0x7d   : > { %v547_v26 = vld [vmem:[#allocation2] sm:$0xff]  ;;  %v559_v37 = vld [vmem:[#allocation2 + $0x70] sm:$0xff]  ;;  %v548_v38 = vld [vmem:[#allocation2 + $0x58] sm:$0xff] }
  0x7e   : > { %v555_v36 = vld [vmem:[#allocation2 + $0x20] sm:$0xff]  ;;  %v552_v39 = vld [vmem:[#allocation2 + $0x8] sm:$0xff]  ;;  %v556_v48 = vld [vmem:[#allocation2 + $0x10] sm:$0xff] }
  0x7f   : > { %676 = vmatpush.bf16.msra.mxu0 %v1716_v4  ;;  %1750 = vmatpush.bf16.msra.mxu1 %v1716_v4  ;;  %v560_v49 = vld [vmem:[#allocation2 + $0x78] sm:$0xff]  ;;  %v553_v51 = vld [vmem:[#allocation2 + $0x48] sm:$0xff] }
  0x80   : > { %1751 = vmatpush.bf16.msra.mxu2 %v1716_v4  ;;  %1752 = vmatpush.bf16.msra.mxu3 %v1716_v4  ;;  %v549_v50 = vld [vmem:[#allocation2 + $0x18] sm:$0xff]  ;;  %v561_v61 = vld [vmem:[#allocation2 + $0x28] sm:$0xff] }
  0x81   : > { %v557_v60 = vld [vmem:[#allocation2 + $0x38] sm:$0xff] }
  0x83   : > { %677 = vmatpush.bf16.msra.mxu0 %v1715_v5  ;;  %1753 = vmatpush.bf16.msra.mxu1 %v1715_v5 }
  0x84   : > { %1754 = vmatpush.bf16.msra.mxu2 %v1715_v5  ;;  %1755 = vmatpush.bf16.msra.mxu3 %v1715_v5 }
  0x87   : > { %678 = vmatpush.bf16.msra.mxu0 %v1714_v6  ;;  %1756 = vmatpush.bf16.msra.mxu1 %v1714_v6 }
  0x88   : > { %1757 = vmatpush.bf16.msra.mxu2 %v1714_v6  ;;  %1758 = vmatpush.bf16.msra.mxu3 %v1714_v6 }
  0x8b   : > { %679 = vmatpush.bf16.msra.mxu0 %v1713_v7  ;;  %1759 = vmatpush.bf16.msra.mxu1 %v1713_v7 }
  0x8c   : > { %1760 = vmatpush.bf16.msra.mxu2 %v1713_v7  ;;  %1761 = vmatpush.bf16.msra.mxu3 %v1713_v7 }
  0x8f   : > { %680 = vmatpush.bf16.msra.mxu0 %v1712_v8  ;;  %1762 = vmatpush.bf16.msra.mxu1 %v1712_v8 }
  0x90   : > { %1763 = vmatpush.bf16.msra.mxu2 %v1712_v8  ;;  %1764 = vmatpush.bf16.msra.mxu3 %v1712_v8 }
  0x93   : > { %681 = vmatpush.bf16.msra.mxu0 %v1711_v9  ;;  %1765 = vmatpush.bf16.msra.mxu1 %v1711_v9 }
  0x94   : > { %1766 = vmatpush.bf16.msra.mxu2 %v1711_v9  ;;  %1767 = vmatpush.bf16.msra.mxu3 %v1711_v9 }
  0x96   : > { %682 = vmatmul.bf16.vlgmr.msra.gmra.mxu0 %v1719_v10  ;;  %692 = vmatmul.bf16.vlgmr.msra.gmra.mxu1 %v1721_v11 }
  0x97   : > { %702 = vmatmul.bf16.vlgmr.msra.gmra.mxu2 %v1723_v12  ;;  %712 = vmatmul.bf16.vlgmr.msra.gmra.mxu3 %v1725_v13 }
  0xa6   : > { %687 = vmatmul.bf16.gmra.mxu0 %v1720_v14  ;;  %697 = vmatmul.bf16.gmra.mxu1 %v1722_v15 }
  0xa7   : > { %707 = vmatmul.bf16.gmra.mxu2 %v1724_v16  ;;  %717 = vmatmul.bf16.gmra.mxu3 %v1726_v17 }
 0x113   : > { %v683_v20 = vpop.f32.mrf.mxu0  ;;  %v693_v21 = vpop.f32.mrf.mxu1 }
 0x114   : > { %v723_v22 = vadd.f32 %v683_v20, %v546_v18  ;;  %v727_v23 = vadd.f32 %v693_v21, %v550_v19 }
 0x116   : > { %739 = vst [vmem:[#allocation2 + $0x30] sm:$0xff] %v723_v22 }
 0x117   : > { %743 = vst [vmem:[#allocation2 + $0x50] sm:$0xff] %v727_v23 }
 0x11a   : > { %v703_v28 = vpop.f32.mrf.mxu2  ;;  %v713_v29 = vpop.f32.mrf.mxu3 }
 0x11b   : > { %v731_v30 = vadd.f32 %v703_v28, %v554_v24  ;;  %v735_v31 = vadd.f32 %v713_v29, %v558_v25  ;;  %v685_v32 = vpop.f32.mrf.mxu0  ;;  %v695_v33 = vpop.f32.mrf.mxu1 }
 0x11c   : > { %v724_v34 = vadd.f32 %v685_v32, %v547_v26  ;;  %v728_v35 = vadd.f32 %v695_v33, %v551_v27 }
 0x11d   : > { %747 = vst [vmem:[#allocation2 + $0x40] sm:$0xff] %v731_v30 }
 0x11e   : > { %751 = vst [vmem:[#allocation2 + $0x60] sm:$0xff] %v735_v31 }
 0x11f   : > { %740 = vst [vmem:[#allocation2] sm:$0xff] %v724_v34 }
 0x120   : > { %744 = vst [vmem:[#allocation2 + $0x68] sm:$0xff] %v728_v35 }
 0x122   : > { %v705_v40 = vpop.f32.mrf.mxu2  ;;  %v715_v41 = vpop.f32.mrf.mxu3 }
 0x123   : > { %v732_v42 = vadd.f32 %v705_v40, %v555_v36  ;;  %v736_v43 = vadd.f32 %v715_v41, %v559_v37  ;;  %v688_v44 = vpop.f32.mrf.mxu0  ;;  %v698_v45 = vpop.f32.mrf.mxu1 }
 0x124   : > { %v725_v46 = vadd.f32 %v688_v44, %v548_v38  ;;  %v729_v47 = vadd.f32 %v698_v45, %v552_v39 }
 0x125   : > { %748 = vst [vmem:[#allocation2 + $0x20] sm:$0xff] %v732_v42 }
 0x126   : > { %752 = vst [vmem:[#allocation2 + $0x70] sm:$0xff] %v736_v43 }
 0x127   : > { %741 = vst [vmem:[#allocation2 + $0x58] sm:$0xff] %v725_v46 }
 0x128   : > { %745 = vst [vmem:[#allocation2 + $0x8] sm:$0xff] %v729_v47 }
 0x12a   : > { %v708_v52 = vpop.f32.mrf.mxu2  ;;  %v718_v53 = vpop.f32.mrf.mxu3 }
 0x12b   : > { %v733_v54 = vadd.f32 %v708_v52, %v556_v48  ;;  %v737_v55 = vadd.f32 %v718_v53, %v560_v49  ;;  %v690_v56 = vpop.f32.mrf.mxu0  ;;  %v700_v57 = vpop.f32.mrf.mxu1 }
 0x12c   : > { %v726_v58 = vadd.f32 %v690_v56, %v549_v50  ;;  %v730_v59 = vadd.f32 %v700_v57, %v553_v51 }
 0x12d   : > { %749 = vst [vmem:[#allocation2 + $0x10] sm:$0xff] %v733_v54 }
 0x12e   : > { %753 = vst [vmem:[#allocation2 + $0x78] sm:$0xff] %v737_v55 }
 0x12f   : > { %742 = vst [vmem:[#allocation2 + $0x18] sm:$0xff] %v726_v58 }
 0x130   : > { %746 = vst [vmem:[#allocation2 + $0x48] sm:$0xff] %v730_v59 }
 0x132   : > { %v710_v62 = vpop.f32.mrf.mxu2  ;;  %v720_v63 = vpop.f32.mrf.mxu3 }
 0x133   : > { %v734_v0 = vadd.f32 %v710_v62, %v557_v60  ;;  %v738_v1 = vadd.f32 %v720_v63, %v561_v61 }
 0x135   : > { %750 = vst [vmem:[#allocation2 + $0x38] sm:$0xff] %v734_v0 }
 0x136   : > { %754 = vst [vmem:[#allocation2 + $0x28] sm:$0xff] %v738_v1 }
 0x137 PF: > { %756 = sbr.rel (!%p463_p13) target bundleno = 515 (0x203), region = 60  ;;  %v793_v2 = vld [vmem:[%s2302_s25 + $0x20] sm:$0xff] (%p463_p13)  ;;  %v791_v3 = vld [vmem:[%s2302_s25 + $0x10] sm:$0xff] (%p463_p13)  ;;  %v2086_v5 = vmov (%p463_p13), 0   ;;  %v794_v6 = vld [vmem:[%s2302_s25 + $0x28] sm:$0xff] (%p463_p13)  ;;  %v2087_v19 = vmov (%p463_p13), 1  }
 0x138   : > { %v789_v4 = vld [vmem:[%s2302_s25] sm:$0xff] (%p463_p13)  ;;  %1869 = vset.pattern.permute.xlu2 (%p463_p13), %v2086_v5  ;;  %1868 = vset.pattern.permute.xlu1 (%p463_p13), %v2086_v5  ;;  %v792_v7 = vld [vmem:[%s2302_s25 + $0x18] sm:$0xff] (%p463_p13)  ;;  %v790_v8 = vld [vmem:[%s2302_s25 + $0x8] sm:$0xff] (%p463_p13) }
 0x139   : > { %1867 = vset.pattern.permute.xlu0 (%p463_p13), %v2086_v5  ;;  %827 = vperm.xlu2 (%p463_p13), %1869, %v793_v2   ;;  %v797_v9 = vld [vmem:[%s2302_s25 + $0x40] sm:$0xff] (%p463_p13)  ;;  %v796_v10 = vld [vmem:[%s2302_s25 + $0x38] sm:$0xff] (%p463_p13)  ;;  %v795_v11 = vld [vmem:[%s2302_s25 + $0x30] sm:$0xff] (%p463_p13) }
 0x13a   : > { %817 = vperm.xlu1 (%p463_p13), %1868, %v791_v3   ;;  %807 = vperm.xlu0 (%p463_p13), %1867, %v789_v4   ;;  %v800_v12 = vld [vmem:[%s2302_s25 + $0x58] sm:$0xff] (%p463_p13)  ;;  %v799_v13 = vld [vmem:[%s2302_s25 + $0x50] sm:$0xff] (%p463_p13)  ;;  %v798_v14 = vld [vmem:[%s2302_s25 + $0x48] sm:$0xff] (%p463_p13) }
 0x13b   : > { %v803_v15 = vld [vmem:[%s2302_s25 + $0x70] sm:$0xff] (%p463_p13)  ;;  %v802_v16 = vld [vmem:[%s2302_s25 + $0x68] sm:$0xff] (%p463_p13)  ;;  %v801_v17 = vld [vmem:[%s2302_s25 + $0x60] sm:$0xff] (%p463_p13) }
 0x13c   : > { %v804_v18 = vld [vmem:[%s2302_s25 + $0x78] sm:$0xff]  ;;  %v2349_v20 = vld [vmem:[#allocation2 + $0x50] sm:$0xff]  ;;  %v777_v22 = vld [vmem:[#allocation3 + $0xc8] sm:$0xff] }
 0x13d   : > { %v2352_v25 = vld [vmem:[#allocation2 + $0x68] sm:$0xff]  ;;  %v778_v27 = vld [vmem:[#allocation3 + $0xb0] sm:$0xff]  ;;  %v2355_v30 = vld [vmem:[#allocation2 + $0x40] sm:$0xff] }
 0x13e   : > { %v781_v32 = vld [vmem:[#allocation3 + $0x48] sm:$0xff]  ;;  %v2358_v35 = vld [vmem:[#allocation2 + $0x38] sm:$0xff]  ;;  %v2362_v37 = vld [vmem:[#allocation2 + $0x30] sm:$0xff] }
 0x13f   : > { %v2360_v36 = vld [vmem:[#allocation2 + $0x58] sm:$0xff]  ;;  %v784_v39 = vld [vmem:[#allocation3 + $0x88] sm:$0xff]  ;;  %v775_v42 = vld [vmem:[#allocation3 + $0x10] sm:$0xff] }
 0x140   : > { %v773_v44 = vld [vmem:[#allocation3 + $0xa8] sm:$0xff]  ;;  %v2367_v50 = vld [vmem:[#allocation2 + $0x78] sm:$0xff]  ;;  %v758_v52 = vld [vmem:[#allocation2] sm:$0xff] }
 0x141   : > { %832 = vperm.xlu2 %1869, %v794_v6   ;;  %v2369_v51 = vld [vmem:[#allocation2 + $0x18] sm:$0xff]  ;;  %v787_v54 = vld [vmem:[#allocation3 + $0x30] sm:$0xff]  ;;  %v776_v57 = vld [vmem:[#allocation3 + $0xc0] sm:$0xff] }
 0x142   : > { %822 = vperm.xlu1 %1868, %v792_v7   ;;  %812 = vperm.xlu0 %1867, %v790_v8   ;;  %v774_v59 = vld [vmem:[#allocation3 + $0x68] sm:$0xff] }
 0x143   : > { %v2373_v1 = vld [vmem:[#allocation2 + $0x48] sm:$0xff] }
 0x149   : > { %847 = vperm.xlu2 %1869, %v797_v9  }
 0x14a   : > { %842 = vperm.xlu1 %1868, %v796_v10   ;;  %837 = vperm.xlu0 %1867, %v795_v11  }
 0x151   : > { %862 = vperm.xlu2 %1869, %v800_v12  }
 0x152   : > { %857 = vperm.xlu1 %1868, %v799_v13   ;;  %852 = vperm.xlu0 %1867, %v798_v14  }
 0x159   : > { %877 = vperm.xlu2 %1869, %v803_v15  }
 0x15a   : > { %872 = vperm.xlu1 %1868, %v802_v16   ;;  %867 = vperm.xlu0 %1867, %v801_v17  }
 0x161   : > { %1871 = vset.pattern.permute.xlu2 %v2087_v19 }
 0x162   : > { %1870 = vset.pattern.permute.xlu1 %v2087_v19  ;;  %882 = vperm.xlu0 %1867, %v804_v18  }
 0x163   : > { %973 = vperm.xlu2 %1871, %v790_v8   ;;  %968 = vperm.xlu1 %1870, %v789_v4   ;;  %v780_v4 = vld [vmem:[#allocation3 + $0x38] sm:$0xff] }
 0x16a   : > { %1872 = vset.pattern.permute.xlu0 %v2087_v19 }
 0x16b   : > { %988 = vperm.xlu2 %1871, %v793_v2   ;;  %983 = vperm.xlu1 %1870, %v792_v7   ;;  %v763_v2 = vld [vmem:[#allocation2 + $0x8] sm:$0xff] }
 0x16c   : > { %978 = vperm.xlu0 %1872, %v791_v3  }
 0x173   : > { %998 = vperm.xlu2 %1871, %v795_v11   ;;  %993 = vperm.xlu1 %1870, %v794_v6   ;;  %v779_v6 = vld [vmem:[#allocation3 + $0x70] sm:$0xff] }
 0x174   : > { %1003 = vperm.xlu0 %1872, %v796_v10  }
 0x17b   : > { %1013 = vperm.xlu2 %1871, %v798_v14   ;;  %1008 = vperm.xlu1 %1870, %v797_v9   ;;  %v935_v9 = vld [vmem:[#allocation3 + $0xd0] sm:$0xff] }
 0x17c   : > { %1018 = vperm.xlu0 %1872, %v799_v13  }
 0x183   : > { %1028 = vperm.xlu2 %1871, %v801_v17   ;;  %1023 = vperm.xlu1 %1870, %v800_v12  }
 0x184   : > { %1033 = vperm.xlu0 %1872, %v802_v16   ;;  %v766_v16 = vld [vmem:[#allocation2 + $0x20] sm:$0xff] }
 0x18b   : > { %1043 = vperm.xlu2 %1871, %v804_v18   ;;  %1038 = vperm.xlu1 %1870, %v803_v15   ;;  %v2376_v15 = vld [vmem:[#allocation2 + $0x10] sm:$0xff]  ;;  %v783_v18 = vld [vmem:[#allocation3 + $0x78] sm:$0xff] }
 0x193   : > { %v828_v21 = vpop.permute.xlu2 %827 }
 0x194   : > { %v889_v23 = vmul.f32 %v828_v21, %v2349_v20  ;;  %v782_v21 = vld [vmem:[#allocation3 + $0xf8] sm:$0xff] }
 0x196   : > { %v905_v24 = vadd.f32 %v889_v23, %v777_v22 }
 0x198   : > { %921 = vst [vmem:[#allocation3 + $0xc8] sm:$0xff] %v905_v24  ;;  %v938_v24 = vld [vmem:[#allocation3 + $0x80] sm:$0xff] }
 0x19b   : > { %v833_v26 = vpop.permute.xlu2 %832 }
 0x19c   : > { %v890_v28 = vmul.f32 %v833_v26, %v2352_v25 }
 0x19e   : > { %v906_v29 = vadd.f32 %v890_v28, %v778_v27 }
 0x1a0   : > { %922 = vst [vmem:[#allocation3 + $0xb0] sm:$0xff] %v906_v29 }
 0x1a3   : > { %v848_v31 = vpop.permute.xlu2 %847 }
 0x1a4   : > { %v893_v33 = vmul.f32 %v848_v31, %v2355_v30 }
 0x1a6   : > { %v909_v34 = vadd.f32 %v893_v33, %v781_v32  ;;  %v2380_v32 = vld [vmem:[#allocation2 + $0x70] sm:$0xff]  ;;  %v769_v33 = vld [vmem:[#allocation2 + $0x60] sm:$0xff] }
 0x1a8   : > { %925 = vst [vmem:[#allocation3 + $0x48] sm:$0xff] %v909_v34 }
 0x1ab   : > { %v863_v38 = vpop.permute.xlu2 %862 }
 0x1ac   : > { %v896_v40 = vmul.f32 %v863_v38, %v2358_v35  ;;  %v818_v41 = vpop.permute.xlu1 %817  ;;  %v808_v43 = vpop.permute.xlu0 %807  ;;  %v786_v38 = vld [vmem:[#allocation3 + $0x18] sm:$0xff] }
 0x1ad   : > { %v887_v45 = vmul.f32 %v818_v41, %v2360_v36  ;;  %v885_v46 = vmul.f32 %v808_v43, %v2362_v37  ;;  %v940_v43 = vld [vmem:[#allocation3 + $0x28] sm:$0xff] }
 0x1ae   : > { %v912_v47 = vadd.f32 %v896_v40, %v784_v39  ;;  %v785_v40 = vld [vmem:[#allocation3 + $0xf0] sm:$0xff] }
 0x1af   : > { %v903_v48 = vadd.f32 %v887_v45, %v775_v42  ;;  %v901_v49 = vadd.f32 %v885_v46, %v773_v44 }
 0x1b0   : > { %928 = vst [vmem:[#allocation3 + $0x88] sm:$0xff] %v912_v47 }
 0x1b1   : > { %919 = vst [vmem:[#allocation3 + $0x10] sm:$0xff] %v903_v48  ;;  %v772_v48 = vld [vmem:[#allocation2 + $0x28] sm:$0xff] }
 0x1b2   : > { %917 = vst [vmem:[#allocation3 + $0xa8] sm:$0xff] %v901_v49 }
 0x1b3   : > { %v878_v53 = vpop.permute.xlu2 %877 }
 0x1b4   : > { %v899_v55 = vmul.f32 %v878_v53, %v2367_v50  ;;  %v823_v56 = vpop.permute.xlu1 %822  ;;  %v813_v58 = vpop.permute.xlu0 %812 }
 0x1b5   : > { %v888_v60 = vmul.f32 %v823_v56, %v2369_v51  ;;  %v886_v61 = vmul.f32 %v813_v58, %v758_v52  ;;  %v934_v56 = vld [vmem:[#allocation3 + $0xb8] sm:$0xff] }
 0x1b6   : > { %v915_v62 = vadd.f32 %v899_v55, %v787_v54  ;;  %v943_v54 = vld [vmem:[#allocation3 + $0xe8] sm:$0xff] }
 0x1b7   : > { %v904_v63 = vadd.f32 %v888_v60, %v776_v57  ;;  %v902_v0 = vadd.f32 %v886_v61, %v774_v59 }
 0x1b8   : > { %931 = vst [vmem:[#allocation3 + $0x30] sm:$0xff] %v915_v62 }
 0x1b9   : > { %920 = vst [vmem:[#allocation3 + $0xc0] sm:$0xff] %v904_v63  ;;  %v946_v63 = vld [vmem:[#allocation3 + $0x8] sm:$0xff] }
 0x1ba   : > { %918 = vst [vmem:[#allocation3 + $0x68] sm:$0xff] %v902_v0 }
 0x1bc   : > { %v843_v3 = vpop.permute.xlu1 %842  ;;  %v838_v5 = vpop.permute.xlu0 %837 }
 0x1bd   : > { %v892_v7 = vmul.f32 %v843_v3, %v2373_v1  ;;  %v891_v8 = vmul.f32 %v838_v5, %v763_v2  ;;  %v974_v10 = vpop.permute.xlu2 %973 }
 0x1be   : > { %v1047_v11 = vmul.f32 %v974_v10, %v758_v52  ;;  %v788_v52 = vld [vmem:[#allocation3 + $0x50] sm:$0xff] }
 0x1bf   : > { %v908_v12 = vadd.f32 %v892_v7, %v780_v4  ;;  %v907_v13 = vadd.f32 %v891_v8, %v779_v6  ;;  %v936_v6 = vld [vmem:[#allocation3 + $0xd8] sm:$0xff] }
 0x1c0   : > { %v1063_v14 = vadd.f32 %v1047_v11, %v935_v9  ;;  %v949_v11 = vld [vmem:[#allocation3 + $0x98] sm:$0xff] }
 0x1c1   : > { %924 = vst [vmem:[#allocation3 + $0x38] sm:$0xff] %v908_v12 }
 0x1c2   : > { %923 = vst [vmem:[#allocation3 + $0x70] sm:$0xff] %v907_v13  ;;  %v939_v13 = vld [vmem:[#allocation3 + $0x40] sm:$0xff] }
 0x1c3   : > { %1079 = vst [vmem:[#allocation3 + $0xd0] sm:$0xff] %v1063_v14 }
 0x1c4   : > { %v858_v17 = vpop.permute.xlu1 %857  ;;  %v853_v19 = vpop.permute.xlu0 %852 }
 0x1c5   : > { %v895_v22 = vmul.f32 %v858_v17, %v2376_v15  ;;  %v894_v23 = vmul.f32 %v853_v19, %v766_v16  ;;  %v989_v26 = vpop.permute.xlu2 %988 }
 0x1c6   : > { %v1050_v27 = vmul.f32 %v989_v26, %v2349_v20 }
 0x1c7   : > { %v911_v28 = vadd.f32 %v895_v22, %v783_v18  ;;  %v910_v29 = vadd.f32 %v894_v23, %v782_v21  ;;  %v941_v18 = vld [vmem:[#allocation3] sm:$0xff]  ;;  %v942_v23 = vld [vmem:[#allocation3 + $0x90] sm:$0xff] }
 0x1c8   : > { %v1066_v31 = vadd.f32 %v1050_v27, %v938_v24  ;;  %v944_v27 = vld [vmem:[#allocation3 + $0xa0] sm:$0xff] }
 0x1c9   : > { %927 = vst [vmem:[#allocation3 + $0x78] sm:$0xff] %v911_v28 }
 0x1ca   : > { %926 = vst [vmem:[#allocation3 + $0xf8] sm:$0xff] %v910_v29 }
 0x1cb   : > { %1082 = vst [vmem:[#allocation3 + $0x80] sm:$0xff] %v1066_v31 }
 0x1cc   : > { %v873_v34 = vpop.permute.xlu1 %872  ;;  %v868_v39 = vpop.permute.xlu0 %867 }
 0x1cd   : > { %v898_v41 = vmul.f32 %v873_v34, %v2380_v32  ;;  %v897_v42 = vmul.f32 %v868_v39, %v769_v33  ;;  %v999_v44 = vpop.permute.xlu2 %998 }
 0x1ce   : > { %v1052_v45 = vmul.f32 %v999_v44, %v763_v2  ;;  %v937_v2 = vld [vmem:[#allocation3 + $0x58] sm:$0xff] }
 0x1cf   : > { %v914_v20 = vadd.f32 %v898_v41, %v786_v38  ;;  %v913_v46 = vadd.f32 %v897_v42, %v785_v40  ;;  %v947_v38 = vld [vmem:[#allocation3 + $0xe0] sm:$0xff] }
 0x1d0   : > { %v1068_v47 = vadd.f32 %v1052_v45, %v940_v43 }
 0x1d1   : > { %930 = vst [vmem:[#allocation3 + $0x18] sm:$0xff] %v914_v20 }
 0x1d2   : > { %929 = vst [vmem:[#allocation3 + $0xf0] sm:$0xff] %v913_v46 }
 0x1d3   : > { %1084 = vst [vmem:[#allocation3 + $0x28] sm:$0xff] %v1068_v47 }
 0x1d4   : > { %v883_v49 = vpop.permute.xlu0 %882 }
 0x1d5   : > { %v900_v53 = vmul.f32 %v883_v49, %v772_v48  ;;  %v1014_v55 = vpop.permute.xlu2 %1013  ;;  %v969_v57 = vpop.permute.xlu1 %968 }
 0x1d6   : > { %v1055_v58 = vmul.f32 %v1014_v55, %v766_v16  ;;  %v1046_v59 = vmul.f32 %v969_v57, %v2362_v37 }
 0x1d7   : > { %v916_v60 = vadd.f32 %v900_v53, %v788_v52 }
 0x1d8   : > { %v1071_v61 = vadd.f32 %v1055_v58, %v943_v54  ;;  %v1062_v62 = vadd.f32 %v1046_v59, %v934_v56 }
 0x1d9   : > { %932 = vst [vmem:[#allocation3 + $0x50] sm:$0xff] %v916_v60 }
 0x1da   : > { %1087 = vst [vmem:[#allocation3 + $0xe8] sm:$0xff] %v1071_v61 }
 0x1db   : > { %1078 = vst [vmem:[#allocation3 + $0xb8] sm:$0xff] %v1062_v62 }
 0x1dd   : > { %v1029_v0 = vpop.permute.xlu2 %1028  ;;  %v984_v3 = vpop.permute.xlu1 %983 }
 0x1de   : > { %v1058_v4 = vmul.f32 %v1029_v0, %v769_v33  ;;  %v1049_v5 = vmul.f32 %v984_v3, %v2369_v51  ;;  %v979_v7 = vpop.permute.xlu0 %978  ;;  %v945_v33 = vld [vmem:[#allocation3 + $0x20] sm:$0xff] }
 0x1df   : > { %v1048_v8 = vmul.f32 %v979_v7, %v2360_v36 }
 0x1e0   : > { %v1074_v9 = vadd.f32 %v1058_v4, %v946_v63  ;;  %v1065_v10 = vadd.f32 %v1049_v5, %v937_v2 }
 0x1e1   : > { %v1064_v37 = vadd.f32 %v1048_v8, %v936_v6 }
 0x1e2   : > { %1090 = vst [vmem:[#allocation3 + $0x8] sm:$0xff] %v1074_v9 }
 0x1e3   : > { %1081 = vst [vmem:[#allocation3 + $0x58] sm:$0xff] %v1065_v10 }
 0x1e4   : > { %1080 = vst [vmem:[#allocation3 + $0xd8] sm:$0xff] %v1064_v37 }
 0x1e5   : > { %v1044_v12 = vpop.permute.xlu2 %1043  ;;  %v994_v14 = vpop.permute.xlu1 %993 }
 0x1e6   : > { %v1061_v16 = vmul.f32 %v1044_v12, %v772_v48  ;;  %v1051_v17 = vmul.f32 %v994_v14, %v2352_v25  ;;  %v1004_v19 = vpop.permute.xlu0 %1003 }
 0x1e7   : > { %v1053_v51 = vmul.f32 %v1004_v19, %v2373_v1 }
 0x1e8   : > { %v1077_v21 = vadd.f32 %v1061_v16, %v949_v11  ;;  %v1067_v22 = vadd.f32 %v1051_v17, %v939_v13 }
 0x1e9   : > { %v1069_v36 = vadd.f32 %v1053_v51, %v941_v18 }
 0x1ea   : > { %1093 = vst [vmem:[#allocation3 + $0x98] sm:$0xff] %v1077_v21 }
 0x1eb   : > { %1083 = vst [vmem:[#allocation3 + $0x40] sm:$0xff] %v1067_v22 }
 0x1ec   : > { %1085 = vst [vmem:[#allocation3] sm:$0xff] %v1069_v36 }
 0x1ed   : > { %v1009_v24 = vpop.permute.xlu1 %1008 }
 0x1ee   : > { %v1054_v26 = vmul.f32 %v1009_v24, %v2355_v30  ;;  %v1019_v28 = vpop.permute.xlu0 %1018  ;;  %v948_v30 = vld [vmem:[#allocation3 + $0x60] sm:$0xff] }
 0x1ef   : > { %v1056_v29 = vmul.f32 %v1019_v28, %v2376_v15 }
 0x1f0   : > { %v1070_v31 = vadd.f32 %v1054_v26, %v942_v23 }
 0x1f1   : > { %v1072_v25 = vadd.f32 %v1056_v29, %v944_v27 }
 0x1f2   : > { %1086 = vst [vmem:[#allocation3 + $0x90] sm:$0xff] %v1070_v31 }
 0x1f3   : > { %1088 = vst [vmem:[#allocation3 + $0xa0] sm:$0xff] %v1072_v25 }
 0x1f5   : > { %v1024_v1 = vpop.permute.xlu1 %1023 }
 0x1f6   : > { %v1057_v34 = vmul.f32 %v1024_v1, %v2358_v35  ;;  %v1034_v39 = vpop.permute.xlu0 %1033 }
 0x1f7   : > { %v1059_v40 = vmul.f32 %v1034_v39, %v2380_v32 }
 0x1f8   : > { %v1073_v41 = vadd.f32 %v1057_v34, %v945_v33 }
 0x1f9   : > { %v1075_v42 = vadd.f32 %v1059_v40, %v947_v38 }
 0x1fa   : > { %1089 = vst [vmem:[#allocation3 + $0x20] sm:$0xff] %v1073_v41 }
 0x1fb   : > { %1091 = vst [vmem:[#allocation3 + $0xe0] sm:$0xff] %v1075_v42 }
 0x1fd   : > { %v1039_v43 = vpop.permute.xlu1 %1038 }
 0x1fe   : > { %v1060_v15 = vmul.f32 %v1039_v43, %v2367_v50 }
 0x200   : > { %v1076_v44 = vadd.f32 %v1060_v15, %v948_v30 }
 0x202   : > { %1092 = vst [vmem:[#allocation3 + $0x60] sm:$0xff] %v1076_v44 }
 0x203 PF: > { %1097 = sbr.rel (!%p2304_p0) target bundleno = 741 (0x2e5), region = 64  ;;  %v1742_v45 = vld [vmem:[#allocation12 + $0x78] sm:$0xff] (%p2304_p0)  ;;  %v1741_v20 = vld [vmem:[#allocation12 + $0x70] sm:$0xff] (%p2304_p0)  ;;  %v1740_v46 = vld [vmem:[#allocation12 + $0x68] sm:$0xff] (%p2304_p0) }
 0x204   : > { %v1734_v35 = vld [vmem:[#allocation12 + $0x38] sm:$0xff] (%p2304_p0)  ;;  %1228 = vmatpush.bf16.msra.mxu0 (%p2304_p0), %v1742_v45  ;;  %1768 = vmatpush.bf16.msra.mxu2 (%p2304_p0), %v1742_v45  ;;  %v1733_v32 = vld [vmem:[#allocation12 + $0x30] sm:$0xff] (%p2304_p0)  ;;  %v1732_v50 = vld [vmem:[#allocation12 + $0x28] sm:$0xff] (%p2304_p0) }
 0x205   : > { %1325 = vmatpush.bf16.msra.mxu1 (%p2304_p0), %v1734_v35  ;;  %1776 = vmatpush.bf16.msra.mxu3 (%p2304_p0), %v1734_v35  ;;  %v1739_v47 = vld [vmem:[#allocation12 + $0x60] sm:$0xff] (%p2304_p0)  ;;  %v1738_v49 = vld [vmem:[#allocation12 + $0x58] sm:$0xff] (%p2304_p0)  ;;  %v1737_v53 = vld [vmem:[#allocation12 + $0x50] sm:$0xff] (%p2304_p0) }
 0x206   : > { %v1731_v48 = vld [vmem:[#allocation12 + $0x20] sm:$0xff] (%p2304_p0)  ;;  %v1730_v52 = vld [vmem:[#allocation12 + $0x18] sm:$0xff] (%p2304_p0)  ;;  %v1729_v54 = vld [vmem:[#allocation12 + $0x10] sm:$0xff] (%p2304_p0) }
 0x207   : > { %v1736_v55 = vld [vmem:[#allocation12 + $0x48] sm:$0xff] (%p2304_p0)  ;;  %v1735_v57 = vld [vmem:[#allocation12 + $0x40] sm:$0xff] (%p2304_p0)  ;;  %v1139_v59 = vld [vmem:[#allocation3 + $0xb8] sm:$0xff] (%p2304_p0) }
 0x208   : > { %1229 = vmatpush.bf16.msra.mxu0 %v1741_v20  ;;  %1769 = vmatpush.bf16.msra.mxu2 %v1741_v20  ;;  %v1728_v56 = vld [vmem:[#allocation12 + $0x8] sm:$0xff]  ;;  %v1727_v58 = vld [vmem:[#allocation12] sm:$0xff]  ;;  %v1140_v60 = vld [vmem:[#allocation3 + $0xd0] sm:$0xff] }
 0x209   : > { %1326 = vmatpush.bf16.msra.mxu1 %v1733_v32  ;;  %1777 = vmatpush.bf16.msra.mxu3 %v1733_v32  ;;  %v1147_v61 = vld [vmem:[#allocation3 + $0x90] sm:$0xff]  ;;  %v1148_v62 = vld [vmem:[#allocation3 + $0xe8] sm:$0xff]  ;;  %v1107_v3 = vld [vmem:[#allocation3 + $0xf8] sm:$0xff]  ;;  %v1155_v4 = vpack.c.bf16 %v1140_v60, %v1139_v59 }
 0x20a   : > { %v1098_v63 = vld [vmem:[#allocation3 + $0xa8] sm:$0xff]  ;;  %v1159_v5 = vpack.c.bf16 %v1148_v62, %v1147_v61  ;;  %v1141_v8 = vld [vmem:[#allocation3 + $0xd8] sm:$0xff]  ;;  %v1149_v10 = vld [vmem:[#allocation3 + $0xa0] sm:$0xff] }
 0x20b   : > { %v1099_v0 = vld [vmem:[#allocation3 + $0x68] sm:$0xff]  ;;  %v1142_v9 = vld [vmem:[#allocation3 + $0x58] sm:$0xff]  ;;  %v1150_v37 = vld [vmem:[#allocation3 + $0x20] sm:$0xff] }
 0x20c   : > { %1230 = vmatpush.bf16.msra.mxu0 %v1740_v46  ;;  %1770 = vmatpush.bf16.msra.mxu2 %v1740_v46  ;;  %v1106_v2 = vld [vmem:[#allocation3 + $0x48] sm:$0xff]  ;;  %v1114_v6 = vpack.c.bf16 %v1099_v0, %v1098_v63  ;;  %v1100_v11 = vld [vmem:[#allocation3 + $0x10] sm:$0xff]  ;;  %v1101_v12 = vld [vmem:[#allocation3 + $0xc0] sm:$0xff]  ;;  %v1156_v16 = vpack.c.bf16 %v1142_v9, %v1141_v8  ;;  %v1160_v17 = vpack.c.bf16 %v1150_v37, %v1149_v10 }
 0x20d   : > { %1327 = vmatpush.bf16.msra.mxu1 %v1732_v50  ;;  %1778 = vmatpush.bf16.msra.mxu3 %v1732_v50  ;;  %v1118_v7 = vpack.c.bf16 %v1107_v3, %v1106_v2  ;;  %v1108_v13 = vld [vmem:[#allocation3 + $0x78] sm:$0xff]  ;;  %v1109_v14 = vld [vmem:[#allocation3 + $0x88] sm:$0xff]  ;;  %v1115_v18 = vpack.c.bf16 %v1101_v12, %v1100_v11  ;;  %v1143_v51 = vld [vmem:[#allocation3 + $0x80] sm:$0xff] }
 0x20e   : > { %v1119_v19 = vpack.c.bf16 %v1109_v14, %v1108_v13  ;;  %v1144_v21 = vld [vmem:[#allocation3 + $0x40] sm:$0xff]  ;;  %v1151_v22 = vld [vmem:[#allocation3 + $0x8] sm:$0xff]  ;;  %v1103_v24 = vld [vmem:[#allocation3 + $0xb0] sm:$0xff] }
 0x20f   : > { %v1152_v36 = vld [vmem:[#allocation3 + $0xe0] sm:$0xff]  ;;  %v1102_v23 = vld [vmem:[#allocation3 + $0xc8] sm:$0xff]  ;;  %v1110_v26 = vld [vmem:[#allocation3 + $0xf0] sm:$0xff]  ;;  %v1157_v28 = vpack.c.bf16 %v1144_v21, %v1143_v51 }
 0x210   : > { %1231 = vmatpush.bf16.msra.mxu0 %v1739_v47  ;;  %1771 = vmatpush.bf16.msra.mxu2 %v1739_v47  ;;  %v1111_v27 = vld [vmem:[#allocation3 + $0x18] sm:$0xff]  ;;  %v1161_v29 = vpack.c.bf16 %v1152_v36, %v1151_v22  ;;  %v1116_v31 = vpack.c.bf16 %v1103_v24, %v1102_v23  ;;  %v1145_v33 = vld [vmem:[#allocation3 + $0x28] sm:$0xff]  ;;  %v1146_v1 = vld [vmem:[#allocation3] sm:$0xff] }
 0x211   : > { %1328 = vmatpush.bf16.msra.mxu1 %v1731_v48  ;;  %1779 = vmatpush.bf16.msra.mxu3 %v1731_v48  ;;  %v1120_v25 = vpack.c.bf16 %v1111_v27, %v1110_v26  ;;  %v1153_v34 = vld [vmem:[#allocation3 + $0x60] sm:$0xff]  ;;  %v1154_v38 = vld [vmem:[#allocation3 + $0x98] sm:$0xff]  ;;  %v1104_v39 = vld [vmem:[#allocation3 + $0x70] sm:$0xff]  ;;  %v1158_v30 = vpack.c.bf16 %v1146_v1, %v1145_v33 }
 0x212   : > { %v1105_v40 = vld [vmem:[#allocation3 + $0x38] sm:$0xff]  ;;  %v1112_v41 = vld [vmem:[#allocation3 + $0x30] sm:$0xff]  ;;  %v1162_v43 = vpack.c.bf16 %v1154_v38, %v1153_v34  ;;  %v2398_v35 = vld [vmem:[%s2479_s10] ss:$0 sm:$0xff] }
 0x213   : > { %v1113_v42 = vld [vmem:[#allocation3 + $0x50] sm:$0xff]  ;;  %v1117_v15 = vpack.c.bf16 %v1105_v40, %v1104_v39 }
 0x214   : > { %1232 = vmatpush.bf16.msra.mxu0 %v1738_v49  ;;  %1772 = vmatpush.bf16.msra.mxu2 %v1738_v49  ;;  %v1121_v44 = vpack.c.bf16 %v1113_v42, %v1112_v41 }
 0x215   : > { %1329 = vmatpush.bf16.msra.mxu1 %v1730_v52  ;;  %1780 = vmatpush.bf16.msra.mxu3 %v1730_v52 }
 0x218   : > { %1233 = vmatpush.bf16.msra.mxu0 %v1737_v53  ;;  %1773 = vmatpush.bf16.msra.mxu2 %v1737_v53 }
 0x219   : > { %1330 = vmatpush.bf16.msra.mxu1 %v1729_v54  ;;  %1781 = vmatpush.bf16.msra.mxu3 %v1729_v54 }
 0x21c   : > { %1234 = vmatpush.bf16.msra.mxu0 %v1736_v55  ;;  %1774 = vmatpush.bf16.msra.mxu2 %v1736_v55 }
 0x21d   : > { %1331 = vmatpush.bf16.msra.mxu1 %v1728_v56  ;;  %1782 = vmatpush.bf16.msra.mxu3 %v1728_v56 }
 0x220   : > { %1235 = vmatpush.bf16.msra.mxu0 %v1735_v57  ;;  %1775 = vmatpush.bf16.msra.mxu2 %v1735_v57 }
 0x221   : > { %1332 = vmatpush.bf16.msra.mxu1 %v1727_v58  ;;  %1783 = vmatpush.bf16.msra.mxu3 %v1727_v58 }
 0x223   : > { %1236 = vmatmul.bf16.vlgmr.msra.gmra.mxu0 %v1155_v4  ;;  %1256 = vmatmul.bf16.vlgmr.msra.gmra.mxu2 %v1159_v5 }
 0x224   : > { %1333 = vmatmul.bf16.vlgmr.msra.gmra.mxu1 %v1114_v6  ;;  %1353 = vmatmul.bf16.vlgmr.msra.gmra.mxu3 %v1118_v7 }
 0x233   : > { %1241 = vmatmul.bf16.gmra.mxu0 %v1156_v16  ;;  %1261 = vmatmul.bf16.gmra.mxu2 %v1160_v17 }
 0x234   : > { %1338 = vmatmul.bf16.gmra.mxu1 %v1115_v18  ;;  %1358 = vmatmul.bf16.gmra.mxu3 %v1119_v19 }
 0x243   : > { %1246 = vmatmul.bf16.gmra.mxu0 %v1157_v28  ;;  %1266 = vmatmul.bf16.gmra.mxu2 %v1161_v29 }
 0x244   : > { %1343 = vmatmul.bf16.gmra.mxu1 %v1116_v31  ;;  %1363 = vmatmul.bf16.gmra.mxu3 %v1120_v25 }
 0x253   : > { %1251 = vmatmul.bf16.gmra.mxu0 %v1158_v30  ;;  %1271 = vmatmul.bf16.gmra.mxu2 %v1162_v43 }
 0x254   : > { %1348 = vmatmul.bf16.gmra.mxu1 %v1117_v15  ;;  %1368 = vmatmul.bf16.gmra.mxu3 %v1121_v44 }
 0x2a0   : > { %v1237_v45 = vpop.f32.mrf.mxu0 }
 0x2a1   : > { %v1334_v20 = vpop.f32.mrf.mxu1 }
 0x2a2   : > { %v1335_v32 = vadd.f32 %v1334_v20, %v1237_v45 }
 0x2a4   : > { %v1378_v46 = vadd.f32 %v2398_v35, %v1335_v32 }
 0x2a6   : > { %1394 = vst [vmem:[%s2308_s26] sm:$0xff] %v1378_v46  ;;  %v1257_v50 = vpop.f32.mrf.mxu2 }
 0x2a7   : > { %v1354_v47 = vpop.f32.mrf.mxu3 }
 0x2a8   : > { %v1355_v48 = vadd.f32 %v1354_v47, %v1257_v50  ;;  %v1239_v49 = vpop.f32.mrf.mxu0 }
 0x2a9   : > { %v1336_v52 = vpop.f32.mrf.mxu1 }
 0x2aa   : > { %v1386_v53 = vadd.f32 %v2398_v35, %v1355_v48  ;;  %v1337_v54 = vadd.f32 %v1336_v52, %v1239_v49 }
 0x2ac   : > { %1402 = vst [vmem:[%s2308_s26 + $0x40] sm:$0xff] %v1386_v53  ;;  %v1379_v55 = vadd.f32 %v2398_v35, %v1337_v54 }
 0x2ae   : > { %1395 = vst [vmem:[%s2308_s26 + $0x8] sm:$0xff] %v1379_v55  ;;  %v1259_v56 = vpop.f32.mrf.mxu2 }
 0x2af   : > { %v1356_v57 = vpop.f32.mrf.mxu3 }
 0x2b0   : > { %v1357_v58 = vadd.f32 %v1356_v57, %v1259_v56  ;;  %v1242_v59 = vpop.f32.mrf.mxu0 }
 0x2b1   : > { %v1339_v60 = vpop.f32.mrf.mxu1 }
 0x2b2   : > { %v1387_v61 = vadd.f32 %v2398_v35, %v1357_v58  ;;  %v1340_v62 = vadd.f32 %v1339_v60, %v1242_v59 }
 0x2b4   : > { %1403 = vst [vmem:[%s2308_s26 + $0x48] sm:$0xff] %v1387_v61  ;;  %v1380_v63 = vadd.f32 %v2398_v35, %v1340_v62 }
 0x2b6   : > { %1396 = vst [vmem:[%s2308_s26 + $0x10] sm:$0xff] %v1380_v63  ;;  %v1262_v0 = vpop.f32.mrf.mxu2 }
 0x2b7   : > { %v1359_v2 = vpop.f32.mrf.mxu3 }
 0x2b8   : > { %v1360_v3 = vadd.f32 %v1359_v2, %v1262_v0  ;;  %v1244_v4 = vpop.f32.mrf.mxu0 }
 0x2b9   : > { %v1341_v5 = vpop.f32.mrf.mxu1 }
 0x2ba   : > { %v1388_v6 = vadd.f32 %v2398_v35, %v1360_v3  ;;  %v1342_v7 = vadd.f32 %v1341_v5, %v1244_v4 }
 0x2bc   : > { %1404 = vst [vmem:[%s2308_s26 + $0x50] sm:$0xff] %v1388_v6  ;;  %v1381_v8 = vadd.f32 %v2398_v35, %v1342_v7 }
 0x2be   : > { %1397 = vst [vmem:[%s2308_s26 + $0x18] sm:$0xff] %v1381_v8  ;;  %v1264_v9 = vpop.f32.mrf.mxu2 }
 0x2bf   : > { %v1361_v10 = vpop.f32.mrf.mxu3 }
 0x2c0   : > { %v1362_v37 = vadd.f32 %v1361_v10, %v1264_v9  ;;  %v1247_v11 = vpop.f32.mrf.mxu0 }
 0x2c1   : > { %v1344_v12 = vpop.f32.mrf.mxu1 }
 0x2c2   : > { %v1389_v13 = vadd.f32 %v2398_v35, %v1362_v37  ;;  %v1345_v14 = vadd.f32 %v1344_v12, %v1247_v11 }
 0x2c4   : > { %1405 = vst [vmem:[%s2308_s26 + $0x58] sm:$0xff] %v1389_v13  ;;  %v1382_v16 = vadd.f32 %v2398_v35, %v1345_v14 }
 0x2c6   : > { %1398 = vst [vmem:[%s2308_s26 + $0x20] sm:$0xff] %v1382_v16  ;;  %v1267_v17 = vpop.f32.mrf.mxu2 }
 0x2c7   : > { %v1364_v18 = vpop.f32.mrf.mxu3 }
 0x2c8   : > { %v1365_v19 = vadd.f32 %v1364_v18, %v1267_v17  ;;  %v1249_v51 = vpop.f32.mrf.mxu0 }
 0x2c9   : > { %v1346_v21 = vpop.f32.mrf.mxu1 }
 0x2ca   : > { %v1390_v22 = vadd.f32 %v2398_v35, %v1365_v19  ;;  %v1347_v36 = vadd.f32 %v1346_v21, %v1249_v51 }
 0x2cc   : > { %1406 = vst [vmem:[%s2308_s26 + $0x60] sm:$0xff] %v1390_v22  ;;  %v1383_v23 = vadd.f32 %v2398_v35, %v1347_v36 }
 0x2ce   : > { %1399 = vst [vmem:[%s2308_s26 + $0x28] sm:$0xff] %v1383_v23  ;;  %v1269_v24 = vpop.f32.mrf.mxu2 }
 0x2cf   : > { %v1366_v26 = vpop.f32.mrf.mxu3 }
 0x2d0   : > { %v1367_v27 = vadd.f32 %v1366_v26, %v1269_v24  ;;  %v1252_v28 = vpop.f32.mrf.mxu0 }
 0x2d1   : > { %v1349_v29 = vpop.f32.mrf.mxu1 }
 0x2d2   : > { %v1391_v31 = vadd.f32 %v2398_v35, %v1367_v27  ;;  %v1350_v25 = vadd.f32 %v1349_v29, %v1252_v28 }
 0x2d4   : > { %1407 = vst [vmem:[%s2308_s26 + $0x68] sm:$0xff] %v1391_v31  ;;  %v1384_v33 = vadd.f32 %v2398_v35, %v1350_v25 }
 0x2d6   : > { %1400 = vst [vmem:[%s2308_s26 + $0x30] sm:$0xff] %v1384_v33  ;;  %v1272_v1 = vpop.f32.mrf.mxu2 }
 0x2d7   : > { %v1369_v34 = vpop.f32.mrf.mxu3 }
 0x2d8   : > { %v1370_v38 = vadd.f32 %v1369_v34, %v1272_v1  ;;  %v1254_v39 = vpop.f32.mrf.mxu0 }
 0x2d9   : > { %v1351_v40 = vpop.f32.mrf.mxu1 }
 0x2da   : > { %v1392_v41 = vadd.f32 %v2398_v35, %v1370_v38  ;;  %v1352_v42 = vadd.f32 %v1351_v40, %v1254_v39 }
 0x2dc   : > { %1408 = vst [vmem:[%s2308_s26 + $0x70] sm:$0xff] %v1392_v41  ;;  %v1385_v30 = vadd.f32 %v2398_v35, %v1352_v42 }
 0x2de   : > { %1401 = vst [vmem:[%s2308_s26 + $0x38] sm:$0xff] %v1385_v30  ;;  %v1274_v43 = vpop.f32.mrf.mxu2 }
 0x2df   : > { %v1371_v15 = vpop.f32.mrf.mxu3 }
 0x2e0   : > { %v1372_v44 = vadd.f32 %v1371_v15, %v1274_v43 }
 0x2e2   : > { %v1393_v45 = vadd.f32 %v2398_v35, %v1372_v44 }
 0x2e4   : > { %1409 = vst [vmem:[%s2308_s26 + $0x78] sm:$0xff] %v1393_v45 }
 0x2e5 PF: > { %s1788_s24 = scalar_select %p2215_p3, [#allocation6], [#allocation16] }
 0x2e6   : > { %s2527_s28 = smov (!%p2215_p3, %s2064_s28), 0  ;;  %s1425_s20 = sshll.u32 %s2308_s26, 4  ;;  %s1426_s20 = int_to_ptr.vmem [resolvable:$true] %s1425_s20 }
 0x2e7   : > { %s1418_s17 = sld [smem:[%s1788_s24 + %s2527_s28]]  ;;  %s2505_s18 = sand.u32 1, %s2056_s5  }
 0x2e8   : > { %s1411_s2 = scalar_lea.sflag [#allocation14], %s2505_s18  ;;  %s2008_s23 = scalar_lea.hbm %s2481_s12, 256 }
 0x2ed   : > { %s1743_s22 = sshll.u32 %s1418_s17, 7 }
 0x2ee   : > { %s1424_s13 = scalar_lea.hbm %s2481_s12, %s1743_s22 }
 0x2ef   : > { %s1427_s16 = sshll.u32 %s1424_s13, 4  ;;  %s1428_s16 = int_to_ptr.hbm [resolvable:$true] %s1427_s16 }
 0x2f0   : > { %s2002_s9 = sshra.s32 %s1428_s16, 4  ;;  %s2003_s9 = int_to_ptr.hbm [resolvable:$true] %s2002_s9 }
 0x2f1   : > { %s2004_s21 = scalar_lea.hbm %s2003_s9, 128  ;;  %p2009_p7 = scmp.lt.s32.totalorder %s2003_s9, %s2481_s12 }
 0x2f2   : > { %p2005_p4 = scmp.ne.s32.totalorder %s2003_s9, %s2004_s21  ;;  %p2010_p9 = scmp.lt.s32.totalorder %s2008_s23, %s2004_s21 }
 0x2f4   : > { %p2006_p5 = pnand %p2005_p4, %p2215_p3  ;;  %p2011_p10 = por %p2010_p9, %p2009_p7 }
 0x2f6   : > { %p2007_p6 = pneg %p2006_p5 }
 0x2f8   : > { %p2012_p11 = pnand %p2011_p10, %p2007_p6 }
 0x2fa   : > { %2015 = shalt.err (!%p2012_p11)
}
 0x2fb   : > { %s2088_s19 = smov 128   ;;  %s2089_s26 = smov 8  }
 0x2fc   : > { %1790 = dma.vmem_to_hbm [thread:$0]  (%p2215_p3), %s1426_s20, 2048, %s1428_s16, %s1411_s2, %s2088_s19, %s2088_s19, %s2089_s26  }
 0x2fd PF: > { %p1802_p12 = scmp.ge.s32.totalorder %s2072_s6, 2  ;;  %s1442_s27 = sand.u32 1, %s2052_s4  }
 0x2fe   : > { %s1443_s14 = scalar_lea.sflag [#allocation14], %s1442_s27 }
 0x2ff   : > { %p1797_p13 = pnand %p1802_p12, %p2224_p8 }
 0x301   : > { %p1798_p1 = pneg %p1797_p13 }
 0x303   : > { %2047 = dma.done.wait (%p1798_p1), %s1443_s14, 2048  }
 0x304   : > { %2049 = vsyncadd (%p1798_p1), %s1443_s14, 4294965248  ;;  %s64_s6 = sadd.s32 1, %s2072_s6   ;;  %s2506_s24 = sld [smem:[#allocation20_spill]] }
 0x305   : > { %p61_p0 = scmp.ge.s32.totalorder %s64_s6, 5   ;;  %s2507_s27 = sld [smem:[#allocation23_spill]] }
 0x306   : > { %s2508_s28 = sld [smem:[#allocation21_spill]]  ;;  %s2510_s4 = smov %s2056_s5 }
 0x307   : > { %s2509_s29 = sld [smem:[#allocation22_spill]]  ;;  %63 = sbr.rel (!%p61_p0) target bundleno = 23 (0x17), region = 110 }
 0x30a   : > { %s2511_s5 = smov %s2506_s24 }
 0x30c   :  { %1449 = vsyncpa [#allocation13], 1 }
 0x30d   :  { %1451 = vsyncpa [#allocation13 + $0x1], 1 }
 0x30e   :  { %1452 = vsyncpa [#allocation14], 1 }
 0x30f   :  { %1454 = vsyncpa [#allocation14 + $0x1], 1 }

</bundles_post_ra>
